<compile_context>
chip_gen: v7x
topology: tpu7x:2x2x1
jax: 0.10.0
libtpu: 0.0.40
codegen_flags: <defaults>
</compile_context>

<pallas_src>
import functools

import jax
import jax.numpy as jnp
from jax.experimental import pallas as pl
from jax.experimental.pallas import tpu as pltpu

_VMEM_LIMIT = 32 * 1024 * 1024  # conservative: <= physical on all of v5e/v6e/v7x


def _round_up(n, m):
    return ((n + m - 1) // m) * m


# ---------------------------------------------------------------------------
# Kernel 1: pointwise linear (ConvLinear / nn.Linear), optional NanWrapper mask
#           Row-tiled, lane-dense (Dout padded to a multiple of 128).
# ---------------------------------------------------------------------------
def _linear_kernel(x_ref, w_ref, b_ref, o_ref, *, nan_mask):
    x = x_ref[...]                                            # (TN, Din)
    if nan_mask:
        mask = jnp.logical_not(jnp.any(jnp.isnan(x), axis=-1, keepdims=True))
        x = jnp.where(mask, x, 0.0)
    y = jnp.dot(x, w_ref[...], preferred_element_type=jnp.float32) + b_ref[...]
    if nan_mask:
        y = jnp.where(mask, y, 0.0)
    o_ref[...] = y.astype(o_ref.dtype)


def pointwise_linear(x2d, w, b, nan_mask=False, row_tile=256):
    """y = x @ w.T + b, with optional NaN-row masking (NanWrapper semantics)."""
    N, Din = x2d.shape
    Dout = w.shape[0]
    # TODO(synk): keep matmul operands in f32 for bit-fidelity with the PyTorch
    # reference; cast to bf16 here for extra MXU throughput on v6e/v7x if the
    # accuracy budget allows.
    dout_p = _round_up(max(Dout, 128), 128)                   # lane-dense output
    wt = jnp.transpose(w)                                     # (Din, Dout)
    if dout_p != Dout:
        wt = jnp.pad(wt, ((0, 0), (0, dout_p - Dout)))
        b = jnp.pad(b, (0, dout_p - Dout))
    b2 = b.reshape(1, dout_p)

    tn = _round_up(N, 8) if N <= row_tile else row_tile       # row tile
    n_p = _round_up(N, tn)
    x_p = jnp.pad(x2d, ((0, n_p - N), (0, 0))) if n_p != N else x2d

    out = pl.pallas_call(
        functools.partial(_linear_kernel, nan_mask=nan_mask),
        grid=(n_p // tn,),
        in_specs=[
            pl.BlockSpec((tn, Din), lambda i: (i, 0)),
            pl.BlockSpec((Din, dout_p), lambda i: (0, 0)),
            pl.BlockSpec((1, dout_p), lambda i: (0, 0)),
        ],
        out_specs=pl.BlockSpec((tn, dout_p), lambda i: (i, 0)),
        out_shape=jax.ShapeDtypeStruct((n_p, dout_p), jnp.float32),
        compiler_params=pltpu.CompilerParams(
            dimension_semantics=("parallel",),
            vmem_limit_bytes=_VMEM_LIMIT),
    )(x_p, wt, b2)
    return out[:N, :Dout]


# ---------------------------------------------------------------------------
# Kernel 2: both directions of one bidirectional LSTM layer in a single
#           pallas_call (grid axis of size 2, "parallel").  The input
#           projection (incl. biases) is precomputed OUTSIDE this kernel, so
#           the recurrence only does h @ W_hh per step.
#           PyTorch gate order i, f, g, o;  h0 = c0 = 0.
# ---------------------------------------------------------------------------
def lstm_pair(gx_stack, whh_stack):
    """gx_stack: (2, T, B, 4H) precomputed x-gates (+bias), time-major, with the
    backward direction already flipped along T.  whh_stack: (2, H, 4H).
    Returns h_seq (2, T, B, H) and c_final (2, B, H)."""
    _, T, B, H4 = gx_stack.shape
    H = H4 // 4

    def kernel(gx_ref, whh_ref, hseq_ref, cfin_ref):
        whh = whh_ref[...]                                    # (H, 4H)

        def step(t, carry):
            h, c = carry
            gates = gx_ref[t] + jnp.dot(h, whh,
                                        preferred_element_type=jnp.float32)
            sig = jax.nn.sigmoid(gates)                       # one full-4H sigmoid
            g = jnp.tanh(gates[:, 2 * H:3 * H])
            c_new = sig[:, H:2 * H] * c + sig[:, 0:H] * g
            h_new = sig[:, 3 * H:4 * H] * jnp.tanh(c_new)
            hseq_ref[t] = h_new
            return (h_new, c_new)

        h0 = jnp.zeros((B, H), jnp.float32)
        c0 = jnp.zeros((B, H), jnp.float32)
        _, c_fin = jax.lax.fori_loop(0, T, step, (h0, c0))
        cfin_ref[...] = c_fin

    # TODO(synk): for very long sequences add time-axis chunking (stream
    # (T_chunk, B, 4H) blocks with an (h, c) carry) to fit v7x's 64 MiB VMEM.
    hseq, cfin = pl.pallas_call(
        kernel,
        grid=(2,),
        in_specs=[
            pl.BlockSpec((None, T, B, H4), lambda d: (d, 0, 0, 0)),
            pl.BlockSpec((None, H, H4), lambda d: (d, 0, 0)),
        ],
        out_specs=[
            pl.BlockSpec((None, T, B, H), lambda d: (d, 0, 0, 0)),
            pl.BlockSpec((None, B, H), lambda d: (d, 0, 0)),
        ],
        out_shape=[
            jax.ShapeDtypeStruct((2, T, B, H), jnp.float32),
            jax.ShapeDtypeStruct((2, B, H), jnp.float32),
        ],
        compiler_params=pltpu.CompilerParams(
            dimension_semantics=("parallel",),
            vmem_limit_bytes=_VMEM_LIMIT),
    )(gx_stack, whh_stack)
    return hseq, cfin


# ---------------------------------------------------------------------------
# Kernel 3: decoder — constrain() + Euler rollout of the T2D mechanistic ODE.
#           State columns are carried separately (no per-step concatenate);
#           reciprocals / constant scales hoisted out of the serial loop.
# ---------------------------------------------------------------------------
def decode_pallas(seq_tb1, nonseq, lims_lo, lims_hi,
                  *, param_size=6, state_size=4, dt=5.0, max_carb=1000.0):
    """seq_tb1: (T,B,1) seq encoding (time-major); nonseq: (B, P+S);
    lims_lo/hi: (1, P+S) concatenated [param_lims, state_lims] bounds."""
    T, B, _ = seq_tb1.shape
    P, S = param_size, state_size

    def kernel(seq_ref, ns_ref, lo_ref, hi_ref,
               g_ref, x_ref, g1_ref, g2_ref, param_ref, init_ref, carb_ref):
        lo = lo_ref[...]
        hi = hi_ref[...]
        # constrain(x, min, max) = (max - min) * sigmoid(x) + min
        constrained = (hi - lo) * jax.nn.sigmoid(ns_ref[...]) + lo    # (B, P+S)
        param = constrained[:, :P]
        init_state = constrained[:, P:P + S]
        param_ref[...] = param
        init_ref[...] = init_state
        carb_ref[...] = max_carb * jax.nn.sigmoid(seq_ref[...])      # (T,B,1)
        # TODO(synk): decoder dropout is identity in eval mode (not applied).

        tau_m = param[:, 0:1]
        Gb = param[:, 1:2]
        sg = param[:, 2:3]
        si = param[:, 3:4]
        p2 = param[:, 4:5]
        mi = param[:, 5:6]
        vg = 1.0
        bw = 87.5
        inv_tau = 1.0 / tau_m            # hoisted: 3 per-step divides -> muls
        psi = p2 * si                    # hoisted (matches torch eval order)
        c_force = 0.75 / (vg * bw)       # carb*0.75 / (vg*bw) folded to one mul

        G0 = init_state[:, 0:1]
        X0 = init_state[:, 1:2]
        G1_0 = init_state[:, 2:3]
        G2_0 = init_state[:, 3:4]
        g_ref[0] = G0
        x_ref[0] = X0
        g1_ref[0] = G1_0
        g2_ref[0] = G2_0

        def step(i, carry):
            G, X, G1, G2 = carry
            # clamp only for the derivative computation (matches t2d_dynamics)
            Gc = jnp.maximum(G, 0.0)
            Xc = jnp.maximum(X, 0.0)
            G1c = jnp.maximum(G1, 0.0)
            G2c = jnp.maximum(G2, 0.0)
            forcing = carb_ref[i] * c_force                    # (B,1)
            dG1 = -G1c * inv_tau + forcing
            dG2 = -G2c * inv_tau + G1c * inv_tau
            dG = -Xc * Gc - sg * (Gc - Gb) + G2c * inv_tau
            dX = -p2 * Xc + psi * (mi * jnp.maximum(Gc - Gb, 0.0))
            Gn = G + dt * dG
            Xn = X + dt * dX
            G1n = G1 + dt * dG1
            G2n = G2 + dt * dG2
            g_ref[i + 1] = Gn
            x_ref[i + 1] = Xn
            g1_ref[i + 1] = G1n
            g2_ref[i + 1] = G2n
            return (Gn, Xn, G1n, G2n)

        jax.lax.fori_loop(0, T - 1, step, (G0, X0, G1_0, G2_0))

    outs = pl.pallas_call(
        kernel,
        grid=(1,),
        in_specs=[
            pl.BlockSpec((T, B, 1), lambda i: (0, 0, 0)),
            pl.BlockSpec((B, P + S), lambda i: (0, 0)),
            pl.BlockSpec((1, P + S), lambda i: (0, 0)),
            pl.BlockSpec((1, P + S), lambda i: (0, 0)),
        ],
        out_specs=[
            pl.BlockSpec((T, B, 1), lambda i: (0, 0, 0)),   # G
            pl.BlockSpec((T, B, 1), lambda i: (0, 0, 0)),   # X
            pl.BlockSpec((T, B, 1), lambda i: (0, 0, 0)),   # G1
            pl.BlockSpec((T, B, 1), lambda i: (0, 0, 0)),   # G2
            pl.BlockSpec((B, P), lambda i: (0, 0)),
            pl.BlockSpec((B, S), lambda i: (0, 0)),
            pl.BlockSpec((T, B, 1), lambda i: (0, 0, 0)),   # carb rate
        ],
        out_shape=[
            jax.ShapeDtypeStruct((T, B, 1), jnp.float32),
            jax.ShapeDtypeStruct((T, B, 1), jnp.float32),
            jax.ShapeDtypeStruct((T, B, 1), jnp.float32),
            jax.ShapeDtypeStruct((T, B, 1), jnp.float32),
            jax.ShapeDtypeStruct((B, P), jnp.float32),
            jax.ShapeDtypeStruct((B, S), jnp.float32),
            jax.ShapeDtypeStruct((T, B, 1), jnp.float32),
        ],
        compiler_params=pltpu.CompilerParams(
            dimension_semantics=("arbitrary",),
            vmem_limit_bytes=_VMEM_LIMIT),
    )(seq_tb1, nonseq, lims_lo, lims_hi)
    g_seq, x_seq, g1_seq, g2_seq, param, init_state, carb = outs
    states_tb = jnp.concatenate([g_seq, x_seq, g1_seq, g2_seq], axis=-1)
    return states_tb, param, init_state, carb


# ---------------------------------------------------------------------------
# Parameter construction (deterministic, matches module __init__ shapes)
# ---------------------------------------------------------------------------
def make_params(key, meal_size, demographics_size, embedding_size,
                hidden_size, num_layers):
    param_lims = jnp.array([[10.0, 60.0], [80.0, 200.0], [0.005, 0.02],
                            [0.0001, 0.001], [1.0 / 60, 1.0 / 15.0],
                            [0.1, 3.0]], jnp.float32)
    state_lims = jnp.array([[50.0, 300.0], [0.0, 1.0], [0.0, 1.0],
                            [0.0, 100.0]], jnp.float32)
    param_size, state_size = 6, 4
    encoding_size = param_size + state_size
    enc_in = 1 + 1 + 1 + embedding_size + embedding_size
    H = hidden_size
    scale = 0.1

    keys = iter(jax.random.split(key, 64))

    def rnd(shape):
        return scale * jax.random.normal(next(keys), shape, jnp.float32)

    lstm = []
    for layer in range(num_layers):
        d_in = enc_in if layer == 0 else 2 * H
        layer_params = []
        for _direction in range(2):
            layer_params.append(dict(
                w_ih=rnd((4 * H, d_in)), w_hh=rnd((4 * H, H)),
                b_ih=rnd((4 * H,)), b_hh=rnd((4 * H,))))
        lstm.append(layer_params)

    return dict(
        param_lims=param_lims, state_lims=state_lims,
        meal_w=rnd((embedding_size, meal_size)), meal_b=rnd((embedding_size,)),
        demo_w=rnd((embedding_size, demographics_size)), demo_b=rnd((embedding_size,)),
        lstm=lstm,
        seq_w=rnd((2, 2 * H)), seq_b=rnd((2,)),
        ns_w=rnd((2 * encoding_size, 2 * H * num_layers)),
        ns_b=rnd((2 * encoding_size,)),
    )


# ---------------------------------------------------------------------------
# Forward pass (eval mode)
# ---------------------------------------------------------------------------
def mechanistic_autoencoder_forward(params, cgm, timestamps, meals, demographics):
    B, T, _ = cgm.shape
    E = params["meal_w"].shape[0]
    num_layers = len(params["lstm"])
    H = params["lstm"][0][0]["w_hh"].shape[1]

    # ---- encode_dist ----
    cgm_diff = cgm - jnp.concatenate(
        [jnp.zeros_like(cgm[:, :1, :]), cgm[:, :-1, :]], axis=1)

    meal_size = meals.shape[-1]
    meal_emb = pointwise_linear(meals.reshape(B * T, meal_size),
                                params["meal_w"], params["meal_b"],
                                nan_mask=True).reshape(B, T, E)
    demo_emb = pointwise_linear(demographics, params["demo_w"], params["demo_b"],
                                nan_mask=True)                       # (B, E)
    demo_seq = jnp.broadcast_to(demo_emb[:, None, :], (B, T, E))

    enc_in = jnp.concatenate([cgm, cgm_diff, timestamps, meal_emb, demo_seq],
                             axis=-1)                                # (B, T, 3+2E)

    # bidirectional multi-layer LSTM (eval: no inter-layer dropout)
    layer_in_tb = jnp.transpose(enc_in, (1, 0, 2))                   # (T, B, Din)
    cells = []
    for layer in range(num_layers):
        fwd, bwd = params["lstm"][layer]
        din = layer_in_tb.shape[-1]

        # one big MXU matmul for BOTH directions' input projection (+biases)
        w_ih_both = jnp.concatenate([fwd["w_ih"], bwd["w_ih"]], axis=0)  # (8H,Din)
        b_both = jnp.concatenate([fwd["b_ih"] + fwd["b_hh"],
                                  bwd["b_ih"] + bwd["b_hh"]], axis=0)    # (8H,)
        gates2d = pointwise_linear(layer_in_tb.reshape(T * B, din),
                                   w_ih_both, b_both)                    # (T*B, 8H)
        gates = gates2d.reshape(T, B, 8 * H)
        gx_f = gates[..., :4 * H]
        gx_b = jnp.flip(gates[..., 4 * H:], axis=0)      # reverse-time direction
        gx_stack = jnp.stack([gx_f, gx_b], axis=0)                       # (2,T,B,4H)
        whh_stack = jnp.stack([jnp.transpose(fwd["w_hh"]),
                               jnp.transpose(bwd["w_hh"])], axis=0)      # (2,H,4H)

        hseq, cfin = lstm_pair(gx_stack, whh_stack)
        h_f = hseq[0]                                                    # (T,B,H)
        h_b = jnp.flip(hseq[1], axis=0)
        layer_in_tb = jnp.concatenate([h_f, h_b], axis=-1)               # (T,B,2H)
        cells.extend([cfin[0], cfin[1]])

    lstm_out_tb = layer_in_tb                                            # (T,B,2H)
    # c_n.transpose(0,1).flatten(-2): concat order (l0_f, l0_b, l1_f, l1_b, ...)
    cells_flat = jnp.concatenate(cells, axis=-1)                         # (B, 2LH)

    seq_enc_tb = pointwise_linear(lstm_out_tb.reshape(T * B, 2 * H),
                                  params["seq_w"], params["seq_b"]
                                  ).reshape(T, B, 2)
    nonseq_enc = pointwise_linear(cells_flat, params["ns_w"], params["ns_b"])

    seq_enc_bt = jnp.transpose(seq_enc_tb, (1, 0, 2))                    # (B,T,2)
    seq_mean = seq_enc_bt[..., :1]
    seq_std = jax.nn.softplus(seq_enc_bt[..., 1:])
    enc_size = nonseq_enc.shape[-1] // 2
    nonseq_mean = nonseq_enc[:, :enc_size]
    nonseq_std = jax.nn.softplus(nonseq_enc[:, enc_size:])

    # eval mode: samples == means
    seq_sample_tb = seq_enc_tb[..., :1]                                  # (T,B,1)
    nonseq_sample = nonseq_mean                                          # (B, 10)

    # ---- decode (Pallas kernel) ----
    lims_lo = jnp.concatenate([params["param_lims"][:, 0],
                               params["state_lims"][:, 0]]).reshape(1, -1)
    lims_hi = jnp.concatenate([params["param_lims"][:, 1],
                               params["state_lims"][:, 1]]).reshape(1, -1)
    states_tb, param, init_state, carb_tb = decode_pallas(
        seq_sample_tb, nonseq_sample, lims_lo, lims_hi)

    states = jnp.transpose(states_tb, (1, 0, 2))                         # (B,T,4)
    carb_rate = jnp.transpose(carb_tb, (1, 0, 2))                        # (B,T,1)

    return dict(
        states=states, param=param, init_state=init_state, carb_rate=carb_rate,
        seq_q_mean=seq_mean, seq_q_std=seq_std,
        nonseq_q_mean=nonseq_mean, nonseq_q_std=nonseq_std,
    )


# ---------------------------------------------------------------------------
if __name__ == "__main__":
    B, T = 2, 8
    meal_size, demographics_size = 3, 4
    embedding_size, hidden_size, num_layers = 8, 32, 2

    root = jax.random.PRNGKey(0)
    k_params, k_cgm, k_ts, k_meal, k_demo = jax.random.split(root, 5)

    params = make_params(k_params, meal_size, demographics_size,
                         embedding_size, hidden_size, num_layers)

    cgm = 100.0 + 10.0 * jax.random.normal(k_cgm, (B, T, 1), jnp.float32)
    timestamps = jnp.arange(T, dtype=jnp.float32)[None, :, None].repeat(B, axis=0)
    timestamps = timestamps + 0.1 * jax.random.normal(k_ts, (B, T, 1), jnp.float32)
    meals = jax.random.normal(k_meal, (B, T, meal_size), jnp.float32)
    meals = meals.at[0, 3, 1].set(jnp.nan)    # exercise the NanWrapper mask path
    demographics = jax.random.normal(k_demo, (B, demographics_size), jnp.float32)

    fwd = jax.jit(mechanistic_autoencoder_forward)
    out = fwd(params, cgm, timestamps, meals, demographics)
    jax.block_until_ready(out)

    assert out["states"].shape == (B, T, 4)
    assert out["param"].shape == (B, 6)
    assert out["init_state"].shape == (B, 4)
    assert out["carb_rate"].shape == (B, T, 1)
    assert bool(jnp.all(jnp.isfinite(out["states"])))
    assert bool(jnp.all(jnp.isfinite(out["carb_rate"])))
    print("KERNEL_OK")
</pallas_src>

<mosaic_0001>
module attributes {stable_mosaic.version = 11 : i64} {
  func.func @_linear_kernel(%arg0: i32, %arg1: memref<16x3xf32, #tpu.memory_space<vmem>>, %arg2: memref<3x128xf32, #tpu.memory_space<vmem>>, %arg3: memref<1x128xf32, #tpu.memory_space<vmem>>, %arg4: memref<16x128xf32, #tpu.memory_space<vmem>>) attributes {dimension_semantics = [#tpu.dimension_semantics<parallel>], iteration_bounds = array<i64: 1>, scalar_prefetch = 0 : i64, scratch_operands = 0 : i64, tpu.core_type = #tpu.core_type<tc>, window_params = [{transform_indices = @transform_0, window_bounds = array<i64: 16, 3>}, {pipeline_mode = #tpu.pipeline_mode<synchronous>, transform_indices = @transform_1, window_bounds = array<i64: 3, 128>}, {pipeline_mode = #tpu.pipeline_mode<synchronous>, transform_indices = @transform_2, window_bounds = array<i64: 1, 128>}, {transform_indices = @transform_3, window_bounds = array<i64: 16, 128>}]} {
    %c0 = arith.constant 0 : index
    %c0_0 = arith.constant 0 : index
    %0 = vector.load %arg1[%c0, %c0_0] : memref<16x3xf32, #tpu.memory_space<vmem>>, vector<16x3xf32>
    %1 = arith.cmpf one, %0, %0 : vector<16x3xf32>
    %cst = arith.constant 1.000000e+00 : f32
    %cst_1 = arith.constant 0.000000e+00 : f32
    %2 = vector.broadcast %cst : f32 to vector<16x3xf32>
    %3 = vector.broadcast %cst_1 : f32 to vector<16x3xf32>
    %4 = arith.select %1, %2, %3 : vector<16x3xi1>, vector<16x3xf32>
    %cst_2 = arith.constant dense<0xFF800000> : vector<16xf32>
    %5 = vector.multi_reduction <maximumf>, %4, %cst_2 [1] : vector<16x3xf32> to vector<16xf32>
    %cst_3 = arith.constant 0.000000e+00 : f32
    %6 = vector.broadcast %cst_3 : f32 to vector<16xf32>
    %7 = arith.cmpf ogt, %5, %6 : vector<16xf32>
    %8 = vector.shape_cast %7 : vector<16xi1> to vector<16x1xi1>
    %cst_4 = arith.constant dense<true> : vector<16x1xi1>
    %9 = arith.xori %8, %cst_4 : vector<16x1xi1>
    %cst_5 = arith.constant 0.000000e+00 : f32
    %10 = vector.shape_cast %9 : vector<16x1xi1> to vector<16x1xi1>
    %11 = vector.broadcast %10 : vector<16x1xi1> to vector<16x3xi1>
    %12 = vector.broadcast %cst_5 : f32 to vector<16x3xf32>
    %13 = arith.select %11, %0, %12 : vector<16x3xi1>, vector<16x3xf32>
    %c0_6 = arith.constant 0 : index
    %c0_7 = arith.constant 0 : index
    %14 = vector.load %arg2[%c0_6, %c0_7] : memref<3x128xf32, #tpu.memory_space<vmem>>, vector<3x128xf32>
    %cst_8 = arith.constant dense<0.000000e+00> : vector<16x128xf32>
    %15 = tpu.matmul %13, %14, %cst_8 {dimension_numbers = #tpu.dot_dimension_numbers<[1], [0], [0], [1], [0, 0, 1, 1], [], []>} : vector<16x3xf32>, vector<3x128xf32>, vector<16x128xf32> -> vector<16x128xf32>
    %c0_9 = arith.constant 0 : index
    %c0_10 = arith.constant 0 : index
    %16 = vector.load %arg3[%c0_9, %c0_10] : memref<1x128xf32, #tpu.memory_space<vmem>>, vector<1x128xf32>
    %17 = vector.broadcast %16 : vector<1x128xf32> to vector<16x128xf32>
    %18 = arith.addf %15, %17 : vector<16x128xf32>
    %cst_11 = arith.constant 0.000000e+00 : f32
    %19 = vector.shape_cast %9 : vector<16x1xi1> to vector<16x1xi1>
    %20 = vector.broadcast %19 : vector<16x1xi1> to vector<16x128xi1>
    %21 = vector.broadcast %cst_11 : f32 to vector<16x128xf32>
    %22 = arith.select %20, %18, %21 : vector<16x128xi1>, vector<16x128xf32>
    %c0_12 = arith.constant 0 : index
    %c0_13 = arith.constant 0 : index
    %23 = vector.load %arg4[%c0_12, %c0_13] : memref<16x128xf32, #tpu.memory_space<vmem>>, vector<16x128xf32>
    tpu.vector_store %arg4[%c0_12, %c0_13], %22 {strides = array<i32>} : memref<16x128xf32, #tpu.memory_space<vmem>>, vector<16x128xf32>,
    return
  }
  func.func @transform_0(%arg0: i32) -> (i32, i32) {
    %c0_i32 = arith.constant 0 : i32
    %c0_i32_0 = arith.constant 0 : i32
    return %arg0, %c0_i32 : i32, i32
  }
  func.func @transform_1(%arg0: i32) -> (i32, i32) {
    %c0_i32 = arith.constant 0 : i32
    %c0_i32_0 = arith.constant 0 : i32
    %c0_i32_1 = arith.constant 0 : i32
    return %c0_i32, %c0_i32_0 : i32, i32
  }
  func.func @transform_2(%arg0: i32) -> (i32, i32) {
    %c0_i32 = arith.constant 0 : i32
    %c0_i32_0 = arith.constant 0 : i32
    %c0_i32_1 = arith.constant 0 : i32
    return %c0_i32, %c0_i32_0 : i32, i32
  }
  func.func @transform_3(%arg0: i32) -> (i32, i32) {
    %c0_i32 = arith.constant 0 : i32
    %c0_i32_0 = arith.constant 0 : i32
    return %arg0, %c0_i32 : i32, i32
  }
}

module attributes {stable_mosaic.version = 11 : i64} {
  func.func @_linear_kernel(%arg0: i32, %arg1: memref<8x4xf32, #tpu.memory_space<vmem>>, %arg2: memref<4x128xf32, #tpu.memory_space<vmem>>, %arg3: memref<1x128xf32, #tpu.memory_space<vmem>>, %arg4: memref<8x128xf32, #tpu.memory_space<vmem>>) attributes {dimension_semantics = [#tpu.dimension_semantics<parallel>], iteration_bounds = array<i64: 1>, scalar_prefetch = 0 : i64, scratch_operands = 0 : i64, tpu.core_type = #tpu.core_type<tc>, window_params = [{transform_indices = @transform_0, window_bounds = array<i64: 8, 4>}, {pipeline_mode = #tpu.pipeline_mode<synchronous>, transform_indices = @transform_1, window_bounds = array<i64: 4, 128>}, {pipeline_mode = #tpu.pipeline_mode<synchronous>, transform_indices = @transform_2, window_bounds = array<i64: 1, 128>}, {transform_indices = @transform_3, window_bounds = array<i64: 8, 128>}]} {
    %c0 = arith.constant 0 : index
    %c0_0 = arith.constant 0 : index
    %0 = vector.load %arg1[%c0, %c0_0] : memref<8x4xf32, #tpu.memory_space<vmem>>, vector<8x4xf32>
    %1 = arith.cmpf one, %0, %0 : vector<8x4xf32>
    %cst = arith.constant 1.000000e+00 : f32
    %cst_1 = arith.constant 0.000000e+00 : f32
    %2 = vector.broadcast %cst : f32 to vector<8x4xf32>
    %3 = vector.broadcast %cst_1 : f32 to vector<8x4xf32>
    %4 = arith.select %1, %2, %3 : vector<8x4xi1>, vector<8x4xf32>
    %cst_2 = arith.constant dense<0xFF800000> : vector<8xf32>
    %5 = vector.multi_reduction <maximumf>, %4, %cst_2 [1] : vector<8x4xf32> to vector<8xf32>
    %cst_3 = arith.constant 0.000000e+00 : f32
    %6 = vector.broadcast %cst_3 : f32 to vector<8xf32>
    %7 = arith.cmpf ogt, %5, %6 : vector<8xf32>
    %8 = vector.shape_cast %7 : vector<8xi1> to vector<8x1xi1>
    %cst_4 = arith.constant dense<true> : vector<8x1xi1>
    %9 = arith.xori %8, %cst_4 : vector<8x1xi1>
    %cst_5 = arith.constant 0.000000e+00 : f32
    %10 = vector.shape_cast %9 : vector<8x1xi1> to vector<8x1xi1>
    %11 = vector.broadcast %10 : vector<8x1xi1> to vector<8x4xi1>
    %12 = vector.broadcast %cst_5 : f32 to vector<8x4xf32>
    %13 = arith.select %11, %0, %12 : vector<8x4xi1>, vector<8x4xf32>
    %c0_6 = arith.constant 0 : index
    %c0_7 = arith.constant 0 : index
    %14 = vector.load %arg2[%c0_6, %c0_7] : memref<4x128xf32, #tpu.memory_space<vmem>>, vector<4x128xf32>
    %cst_8 = arith.constant dense<0.000000e+00> : vector<8x128xf32>
    %15 = tpu.matmul %13, %14, %cst_8 {dimension_numbers = #tpu.dot_dimension_numbers<[1], [0], [0], [1], [0, 0, 1, 1], [], []>} : vector<8x4xf32>, vector<4x128xf32>, vector<8x128xf32> -> vector<8x128xf32>
    %c0_9 = arith.constant 0 : index
    %c0_10 = arith.constant 0 : index
    %16 = vector.load %arg3[%c0_9, %c0_10] : memref<1x128xf32, #tpu.memory_space<vmem>>, vector<1x128xf32>
    %17 = vector.broadcast %16 : vector<1x128xf32> to vector<8x128xf32>
    %18 = arith.addf %15, %17 : vector<8x128xf32>
    %cst_11 = arith.constant 0.000000e+00 : f32
    %19 = vector.shape_cast %9 : vector<8x1xi1> to vector<8x1xi1>
    %20 = vector.broadcast %19 : vector<8x1xi1> to vector<8x128xi1>
    %21 = vector.broadcast %cst_11 : f32 to vector<8x128xf32>
    %22 = arith.select %20, %18, %21 : vector<8x128xi1>, vector<8x128xf32>
    %c0_12 = arith.constant 0 : index
    %c0_13 = arith.constant 0 : index
    %23 = vector.load %arg4[%c0_12, %c0_13] : memref<8x128xf32, #tpu.memory_space<vmem>>, vector<8x128xf32>
    tpu.vector_store %arg4[%c0_12, %c0_13], %22 {strides = array<i32>} : memref<8x128xf32, #tpu.memory_space<vmem>>, vector<8x128xf32>,
    return
  }
  func.func @transform_0(%arg0: i32) -> (i32, i32) {
    %c0_i32 = arith.constant 0 : i32
    %c0_i32_0 = arith.constant 0 : i32
    return %arg0, %c0_i32 : i32, i32
  }
  func.func @transform_1(%arg0: i32) -> (i32, i32) {
    %c0_i32 = arith.constant 0 : i32
    %c0_i32_0 = arith.constant 0 : i32
    %c0_i32_1 = arith.constant 0 : i32
    return %c0_i32, %c0_i32_0 : i32, i32
  }
  func.func @transform_2(%arg0: i32) -> (i32, i32) {
    %c0_i32 = arith.constant 0 : i32
    %c0_i32_0 = arith.constant 0 : i32
    %c0_i32_1 = arith.constant 0 : i32
    return %c0_i32, %c0_i32_0 : i32, i32
  }
  func.func @transform_3(%arg0: i32) -> (i32, i32) {
    %c0_i32 = arith.constant 0 : i32
    %c0_i32_0 = arith.constant 0 : i32
    return %arg0, %c0_i32 : i32, i32
  }
}

module attributes {stable_mosaic.version = 11 : i64} {
  func.func @_linear_kernel(%arg0: i32, %arg1: memref<16x19xf32, #tpu.memory_space<vmem>>, %arg2: memref<19x256xf32, #tpu.memory_space<vmem>>, %arg3: memref<1x256xf32, #tpu.memory_space<vmem>>, %arg4: memref<16x256xf32, #tpu.memory_space<vmem>>) attributes {dimension_semantics = [#tpu.dimension_semantics<parallel>], iteration_bounds = array<i64: 1>, scalar_prefetch = 0 : i64, scratch_operands = 0 : i64, tpu.core_type = #tpu.core_type<tc>, window_params = [{transform_indices = @transform_0, window_bounds = array<i64: 16, 19>}, {pipeline_mode = #tpu.pipeline_mode<synchronous>, transform_indices = @transform_1, window_bounds = array<i64: 19, 256>}, {pipeline_mode = #tpu.pipeline_mode<synchronous>, transform_indices = @transform_2, window_bounds = array<i64: 1, 256>}, {transform_indices = @transform_3, window_bounds = array<i64: 16, 256>}]} {
    %c0 = arith.constant 0 : index
    %c0_0 = arith.constant 0 : index
    %0 = vector.load %arg1[%c0, %c0_0] : memref<16x19xf32, #tpu.memory_space<vmem>>, vector<16x19xf32>
    %c0_1 = arith.constant 0 : index
    %c0_2 = arith.constant 0 : index
    %1 = vector.load %arg2[%c0_1, %c0_2] : memref<19x256xf32, #tpu.memory_space<vmem>>, vector<19x256xf32>
    %cst = arith.constant dense<0.000000e+00> : vector<16x256xf32>
    %2 = tpu.matmul %0, %1, %cst {dimension_numbers = #tpu.dot_dimension_numbers<[1], [0], [0], [1], [0, 0, 1, 1], [], []>} : vector<16x19xf32>, vector<19x256xf32>, vector<16x256xf32> -> vector<16x256xf32>
    %c0_3 = arith.constant 0 : index
    %c0_4 = arith.constant 0 : index
    %3 = vector.load %arg3[%c0_3, %c0_4] : memref<1x256xf32, #tpu.memory_space<vmem>>, vector<1x256xf32>
    %4 = vector.broadcast %3 : vector<1x256xf32> to vector<16x256xf32>
    %5 = arith.addf %2, %4 : vector<16x256xf32>
    %c0_5 = arith.constant 0 : index
    %c0_6 = arith.constant 0 : index
    %6 = vector.load %arg4[%c0_5, %c0_6] : memref<16x256xf32, #tpu.memory_space<vmem>>, vector<16x256xf32>
    tpu.vector_store %arg4[%c0_5, %c0_6], %5 {strides = array<i32>} : memref<16x256xf32, #tpu.memory_space<vmem>>, vector<16x256xf32>,
    return
  }
  func.func @transform_0(%arg0: i32) -> (i32, i32) {
    %c0_i32 = arith.constant 0 : i32
    %c0_i32_0 = arith.constant 0 : i32
    return %arg0, %c0_i32 : i32, i32
  }
  func.func @transform_1(%arg0: i32) -> (i32, i32) {
    %c0_i32 = arith.constant 0 : i32
    %c0_i32_0 = arith.constant 0 : i32
    %c0_i32_1 = arith.constant 0 : i32
    return %c0_i32, %c0_i32_0 : i32, i32
  }
  func.func @transform_2(%arg0: i32) -> (i32, i32) {
    %c0_i32 = arith.constant 0 : i32
    %c0_i32_0 = arith.constant 0 : i32
    %c0_i32_1 = arith.constant 0 : i32
    return %c0_i32, %c0_i32_0 : i32, i32
  }
  func.func @transform_3(%arg0: i32) -> (i32, i32) {
    %c0_i32 = arith.constant 0 : i32
    %c0_i32_0 = arith.constant 0 : i32
    return %arg0, %c0_i32 : i32, i32
  }
}

module attributes {stable_mosaic.version = 11 : i64} {
  func.func @kernel(%arg0: i32, %arg1: memref<1x8x2x128xf32, #tpu.memory_space<vmem>>, %arg2: memref<1x32x128xf32, #tpu.memory_space<vmem>>, %arg3: memref<1x8x2x32xf32, #tpu.memory_space<vmem>>, %arg4: memref<1x2x32xf32, #tpu.memory_space<vmem>>) attributes {dimension_semantics = [#tpu.dimension_semantics<parallel>], iteration_bounds = array<i64: 2>, scalar_prefetch = 0 : i64, scratch_operands = 0 : i64, tpu.core_type = #tpu.core_type<tc>, window_params = [{transform_indices = @transform_0, window_bounds = array<i64: 1, 8, 2, 128>}, {transform_indices = @transform_1, window_bounds = array<i64: 1, 32, 128>}, {transform_indices = @transform_2, window_bounds = array<i64: 1, 8, 2, 32>}, {transform_indices = @transform_3, window_bounds = array<i64: 1, 2, 32>}]} {
    %c0 = arith.constant 0 : index
    %c0_0 = arith.constant 0 : index
    %c0_1 = arith.constant 0 : index
    %0 = vector.load %arg2[%c0, %c0_0, %c0_1] : memref<1x32x128xf32, #tpu.memory_space<vmem>>, vector<1x32x128xf32>
    %1 = vector.shape_cast %0 : vector<1x32x128xf32> to vector<32x128xf32>
    %cst = arith.constant 0.000000e+00 : f32
    %2 = vector.broadcast %cst : f32 to vector<2x32xf32>
    %cst_2 = arith.constant 0.000000e+00 : f32
    %3 = vector.broadcast %cst_2 : f32 to vector<2x32xf32>
    %c0_i32 = arith.constant 0 : i32
    %c8_i32 = arith.constant 8 : i32
    %4 = arith.addi %c0_i32, %c8_i32 : i32
    %c1_i32 = arith.constant 1 : i32
    %5:2 = scf.for %arg5 = %c0_i32 to %4 step %c1_i32 iter_args(%arg6 = %2, %arg7 = %3) -> (vector<2x32xf32>, vector<2x32xf32>)  : i32 {
      %c0_7 = arith.constant 0 : index
      %9 = arith.index_cast %arg5 : i32 to index
      %c0_8 = arith.constant 0 : index
      %c0_9 = arith.constant 0 : index
      %10 = vector.load %arg1[%c0_7, %9, %c0_8, %c0_9] : memref<1x8x2x128xf32, #tpu.memory_space<vmem>>, vector<1x1x2x128xf32>
      %11 = vector.shape_cast %10 : vector<1x1x2x128xf32> to vector<2x128xf32>
      %cst_10 = arith.constant dense<0.000000e+00> : vector<2x128xf32>
      %12 = tpu.matmul %arg6, %1, %cst_10 {dimension_numbers = #tpu.dot_dimension_numbers<[1], [0], [0], [1], [0, 0, 1, 1], [], []>} : vector<2x32xf32>, vector<32x128xf32>, vector<2x128xf32> -> vector<2x128xf32>
      %13 = arith.addf %11, %12 : vector<2x128xf32>
      %14 = arith.negf %13 : vector<2x128xf32>
      %15 = math.exp %14 : vector<2x128xf32>
      %cst_11 = arith.constant 1.000000e+00 : f32
      %16 = vector.broadcast %cst_11 : f32 to vector<2x128xf32>
      %17 = arith.addf %16, %15 : vector<2x128xf32>
      %18 = arith.divf %16, %17 : vector<2x128xf32>
      %19 = vector.extract_strided_slice %13 {offsets = [0, 64], sizes = [2, 32], strides = [1, 1]} : vector<2x128xf32> to vector<2x32xf32>
      %20 = math.tanh %19 : vector<2x32xf32>
      %21 = vector.extract_strided_slice %18 {offsets = [0, 32], sizes = [2, 32], strides = [1, 1]} : vector<2x128xf32> to vector<2x32xf32>
      %22 = arith.mulf %21, %arg7 : vector<2x32xf32>
      %23 = vector.extract_strided_slice %18 {offsets = [0, 0], sizes = [2, 32], strides = [1, 1]} : vector<2x128xf32> to vector<2x32xf32>
      %24 = arith.mulf %23, %20 : vector<2x32xf32>
      %25 = arith.addf %22, %24 : vector<2x32xf32>
      %26 = vector.extract_strided_slice %18 {offsets = [0, 96], sizes = [2, 32], strides = [1, 1]} : vector<2x128xf32> to vector<2x32xf32>
      %27 = math.tanh %25 : vector<2x32xf32>
      %28 = arith.mulf %26, %27 : vector<2x32xf32>
      %c0_12 = arith.constant 0 : index
      %29 = arith.index_cast %arg5 : i32 to index
      %c0_13 = arith.constant 0 : index
      %c0_14 = arith.constant 0 : index
      %30 = vector.load %arg3[%c0_12, %29, %c0_13, %c0_14] : memref<1x8x2x32xf32, #tpu.memory_space<vmem>>, vector<1x1x2x32xf32>
      %31 = vector.shape_cast %30 : vector<1x1x2x32xf32> to vector<2x32xf32>
      %32 = vector.shape_cast %28 : vector<2x32xf32> to vector<1x1x2x32xf32>
      tpu.vector_store %arg3[%c0_12, %29, %c0_13, %c0_14], %32 {strides = array<i32>} : memref<1x8x2x32xf32, #tpu.memory_space<vmem>>, vector<1x1x2x32xf32>,
      scf.yield %28, %25 : vector<2x32xf32>, vector<2x32xf32>
    }
    %c8_i32_3 = arith.constant 8 : i32
    %c0_4 = arith.constant 0 : index
    %c0_5 = arith.constant 0 : index
    %c0_6 = arith.constant 0 : index
    %6 = vector.load %arg4[%c0_4, %c0_5, %c0_6] : memref<1x2x32xf32, #tpu.memory_space<vmem>>, vector<1x2x32xf32>
    %7 = vector.shape_cast %6 : vector<1x2x32xf32> to vector<2x32xf32>
    %8 = vector.shape_cast %5#1 : vector<2x32xf32> to vector<1x2x32xf32>
    tpu.vector_store %arg4[%c0_4, %c0_5, %c0_6], %8 {strides = array<i32>} : memref<1x2x32xf32, #tpu.memory_space<vmem>>, vector<1x2x32xf32>,
    return
  }
  func.func @transform_0(%arg0: i32) -> (i32, i32, i32, i32) {
    %c0_i32 = arith.constant 0 : i32
    %c0_i32_0 = arith.constant 0 : i32
    %c0_i32_1 = arith.constant 0 : i32
    %c0_i32_2 = arith.constant 0 : i32
    return %arg0, %c0_i32, %c0_i32_0, %c0_i32_1 : i32, i32, i32, i32
  }
  func.func @transform_1(%arg0: i32) -> (i32, i32, i32) {
    %c0_i32 = arith.constant 0 : i32
    %c0_i32_0 = arith.constant 0 : i32
    %c0_i32_1 = arith.constant 0 : i32
    return %arg0, %c0_i32, %c0_i32_0 : i32, i32, i32
  }
  func.func @transform_2(%arg0: i32) -> (i32, i32, i32, i32) {
    %c0_i32 = arith.constant 0 : i32
    %c0_i32_0 = arith.constant 0 : i32
    %c0_i32_1 = arith.constant 0 : i32
    %c0_i32_2 = arith.constant 0 : i32
    return %arg0, %c0_i32, %c0_i32_0, %c0_i32_1 : i32, i32, i32, i32
  }
  func.func @transform_3(%arg0: i32) -> (i32, i32, i32) {
    %c0_i32 = arith.constant 0 : i32
    %c0_i32_0 = arith.constant 0 : i32
    %c0_i32_1 = arith.constant 0 : i32
    return %arg0, %c0_i32, %c0_i32_0 : i32, i32, i32
  }
}

module attributes {stable_mosaic.version = 11 : i64} {
  func.func @_linear_kernel(%arg0: i32, %arg1: memref<16x64xf32, #tpu.memory_space<vmem>>, %arg2: memref<64x256xf32, #tpu.memory_space<vmem>>, %arg3: memref<1x256xf32, #tpu.memory_space<vmem>>, %arg4: memref<16x256xf32, #tpu.memory_space<vmem>>) attributes {dimension_semantics = [#tpu.dimension_semantics<parallel>], iteration_bounds = array<i64: 1>, scalar_prefetch = 0 : i64, scratch_operands = 0 : i64, tpu.core_type = #tpu.core_type<tc>, window_params = [{transform_indices = @transform_0, window_bounds = array<i64: 16, 64>}, {pipeline_mode = #tpu.pipeline_mode<synchronous>, transform_indices = @transform_1, window_bounds = array<i64: 64, 256>}, {pipeline_mode = #tpu.pipeline_mode<synchronous>, transform_indices = @transform_2, window_bounds = array<i64: 1, 256>}, {transform_indices = @transform_3, window_bounds = array<i64: 16, 256>}]} {
    %c0 = arith.constant 0 : index
    %c0_0 = arith.constant 0 : index
    %0 = vector.load %arg1[%c0, %c0_0] : memref<16x64xf32, #tpu.memory_space<vmem>>, vector<16x64xf32>
    %c0_1 = arith.constant 0 : index
    %c0_2 = arith.constant 0 : index
    %1 = vector.load %arg2[%c0_1, %c0_2] : memref<64x256xf32, #tpu.memory_space<vmem>>, vector<64x256xf32>
    %cst = arith.constant dense<0.000000e+00> : vector<16x256xf32>
    %2 = tpu.matmul %0, %1, %cst {dimension_numbers = #tpu.dot_dimension_numbers<[1], [0], [0], [1], [0, 0, 1, 1], [], []>} : vector<16x64xf32>, vector<64x256xf32>, vector<16x256xf32> -> vector<16x256xf32>
    %c0_3 = arith.constant 0 : index
    %c0_4 = arith.constant 0 : index
    %3 = vector.load %arg3[%c0_3, %c0_4] : memref<1x256xf32, #tpu.memory_space<vmem>>, vector<1x256xf32>
    %4 = vector.broadcast %3 : vector<1x256xf32> to vector<16x256xf32>
    %5 = arith.addf %2, %4 : vector<16x256xf32>
    %c0_5 = arith.constant 0 : index
    %c0_6 = arith.constant 0 : index
    %6 = vector.load %arg4[%c0_5, %c0_6] : memref<16x256xf32, #tpu.memory_space<vmem>>, vector<16x256xf32>
    tpu.vector_store %arg4[%c0_5, %c0_6], %5 {strides = array<i32>} : memref<16x256xf32, #tpu.memory_space<vmem>>, vector<16x256xf32>,
    return
  }
  func.func @transform_0(%arg0: i32) -> (i32, i32) {
    %c0_i32 = arith.constant 0 : i32
    %c0_i32_0 = arith.constant 0 : i32
    return %arg0, %c0_i32 : i32, i32
  }
  func.func @transform_1(%arg0: i32) -> (i32, i32) {
    %c0_i32 = arith.constant 0 : i32
    %c0_i32_0 = arith.constant 0 : i32
    %c0_i32_1 = arith.constant 0 : i32
    return %c0_i32, %c0_i32_0 : i32, i32
  }
  func.func @transform_2(%arg0: i32) -> (i32, i32) {
    %c0_i32 = arith.constant 0 : i32
    %c0_i32_0 = arith.constant 0 : i32
    %c0_i32_1 = arith.constant 0 : i32
    return %c0_i32, %c0_i32_0 : i32, i32
  }
  func.func @transform_3(%arg0: i32) -> (i32, i32) {
    %c0_i32 = arith.constant 0 : i32
    %c0_i32_0 = arith.constant 0 : i32
    return %arg0, %c0_i32 : i32, i32
  }
}

module attributes {stable_mosaic.version = 11 : i64} {
  func.func @_linear_kernel(%arg0: i32, %arg1: memref<16x64xf32, #tpu.memory_space<vmem>>, %arg2: memref<64x128xf32, #tpu.memory_space<vmem>>, %arg3: memref<1x128xf32, #tpu.memory_space<vmem>>, %arg4: memref<16x128xf32, #tpu.memory_space<vmem>>) attributes {dimension_semantics = [#tpu.dimension_semantics<parallel>], iteration_bounds = array<i64: 1>, scalar_prefetch = 0 : i64, scratch_operands = 0 : i64, tpu.core_type = #tpu.core_type<tc>, window_params = [{transform_indices = @transform_0, window_bounds = array<i64: 16, 64>}, {pipeline_mode = #tpu.pipeline_mode<synchronous>, transform_indices = @transform_1, window_bounds = array<i64: 64, 128>}, {pipeline_mode = #tpu.pipeline_mode<synchronous>, transform_indices = @transform_2, window_bounds = array<i64: 1, 128>}, {transform_indices = @transform_3, window_bounds = array<i64: 16, 128>}]} {
    %c0 = arith.constant 0 : index
    %c0_0 = arith.constant 0 : index
    %0 = vector.load %arg1[%c0, %c0_0] : memref<16x64xf32, #tpu.memory_space<vmem>>, vector<16x64xf32>
    %c0_1 = arith.constant 0 : index
    %c0_2 = arith.constant 0 : index
    %1 = vector.load %arg2[%c0_1, %c0_2] : memref<64x128xf32, #tpu.memory_space<vmem>>, vector<64x128xf32>
    %cst = arith.constant dense<0.000000e+00> : vector<16x128xf32>
    %2 = tpu.matmul %0, %1, %cst {dimension_numbers = #tpu.dot_dimension_numbers<[1], [0], [0], [1], [0, 0, 1, 1], [], []>} : vector<16x64xf32>, vector<64x128xf32>, vector<16x128xf32> -> vector<16x128xf32>
    %c0_3 = arith.constant 0 : index
    %c0_4 = arith.constant 0 : index
    %3 = vector.load %arg3[%c0_3, %c0_4] : memref<1x128xf32, #tpu.memory_space<vmem>>, vector<1x128xf32>
    %4 = vector.broadcast %3 : vector<1x128xf32> to vector<16x128xf32>
    %5 = arith.addf %2, %4 : vector<16x128xf32>
    %c0_5 = arith.constant 0 : index
    %c0_6 = arith.constant 0 : index
    %6 = vector.load %arg4[%c0_5, %c0_6] : memref<16x128xf32, #tpu.memory_space<vmem>>, vector<16x128xf32>
    tpu.vector_store %arg4[%c0_5, %c0_6], %5 {strides = array<i32>} : memref<16x128xf32, #tpu.memory_space<vmem>>, vector<16x128xf32>,
    return
  }
  func.func @transform_0(%arg0: i32) -> (i32, i32) {
    %c0_i32 = arith.constant 0 : i32
    %c0_i32_0 = arith.constant 0 : i32
    return %arg0, %c0_i32 : i32, i32
  }
  func.func @transform_1(%arg0: i32) -> (i32, i32) {
    %c0_i32 = arith.constant 0 : i32
    %c0_i32_0 = arith.constant 0 : i32
    %c0_i32_1 = arith.constant 0 : i32
    return %c0_i32, %c0_i32_0 : i32, i32
  }
  func.func @transform_2(%arg0: i32) -> (i32, i32) {
    %c0_i32 = arith.constant 0 : i32
    %c0_i32_0 = arith.constant 0 : i32
    %c0_i32_1 = arith.constant 0 : i32
    return %c0_i32, %c0_i32_0 : i32, i32
  }
  func.func @transform_3(%arg0: i32) -> (i32, i32) {
    %c0_i32 = arith.constant 0 : i32
    %c0_i32_0 = arith.constant 0 : i32
    return %arg0, %c0_i32 : i32, i32
  }
}

module attributes {stable_mosaic.version = 11 : i64} {
  func.func @_linear_kernel(%arg0: i32, %arg1: memref<8x128xf32, #tpu.memory_space<vmem>>, %arg2: memref<128x128xf32, #tpu.memory_space<vmem>>, %arg3: memref<1x128xf32, #tpu.memory_space<vmem>>, %arg4: memref<8x128xf32, #tpu.memory_space<vmem>>) attributes {dimension_semantics = [#tpu.dimension_semantics<parallel>], iteration_bounds = array<i64: 1>, scalar_prefetch = 0 : i64, scratch_operands = 0 : i64, tpu.core_type = #tpu.core_type<tc>, window_params = [{transform_indices = @transform_0, window_bounds = array<i64: 8, 128>}, {pipeline_mode = #tpu.pipeline_mode<synchronous>, transform_indices = @transform_1, window_bounds = array<i64: 128, 128>}, {pipeline_mode = #tpu.pipeline_mode<synchronous>, transform_indices = @transform_2, window_bounds = array<i64: 1, 128>}, {transform_indices = @transform_3, window_bounds = array<i64: 8, 128>}]} {
    %c0 = arith.constant 0 : index
    %c0_0 = arith.constant 0 : index
    %0 = vector.load %arg1[%c0, %c0_0] : memref<8x128xf32, #tpu.memory_space<vmem>>, vector<8x128xf32>
    %c0_1 = arith.constant 0 : index
    %c0_2 = arith.constant 0 : index
    %1 = vector.load %arg2[%c0_1, %c0_2] : memref<128x128xf32, #tpu.memory_space<vmem>>, vector<128x128xf32>
    %cst = arith.constant dense<0.000000e+00> : vector<8x128xf32>
    %2 = tpu.matmul %0, %1, %cst {dimension_numbers = #tpu.dot_dimension_numbers<[1], [0], [0], [1], [0, 0, 1, 1], [], []>} : vector<8x128xf32>, vector<128x128xf32>, vector<8x128xf32> -> vector<8x128xf32>
    %c0_3 = arith.constant 0 : index
    %c0_4 = arith.constant 0 : index
    %3 = vector.load %arg3[%c0_3, %c0_4] : memref<1x128xf32, #tpu.memory_space<vmem>>, vector<1x128xf32>
    %4 = vector.broadcast %3 : vector<1x128xf32> to vector<8x128xf32>
    %5 = arith.addf %2, %4 : vector<8x128xf32>
    %c0_5 = arith.constant 0 : index
    %c0_6 = arith.constant 0 : index
    %6 = vector.load %arg4[%c0_5, %c0_6] : memref<8x128xf32, #tpu.memory_space<vmem>>, vector<8x128xf32>
    tpu.vector_store %arg4[%c0_5, %c0_6], %5 {strides = array<i32>} : memref<8x128xf32, #tpu.memory_space<vmem>>, vector<8x128xf32>,
    return
  }
  func.func @transform_0(%arg0: i32) -> (i32, i32) {
    %c0_i32 = arith.constant 0 : i32
    %c0_i32_0 = arith.constant 0 : i32
    return %arg0, %c0_i32 : i32, i32
  }
  func.func @transform_1(%arg0: i32) -> (i32, i32) {
    %c0_i32 = arith.constant 0 : i32
    %c0_i32_0 = arith.constant 0 : i32
    %c0_i32_1 = arith.constant 0 : i32
    return %c0_i32, %c0_i32_0 : i32, i32
  }
  func.func @transform_2(%arg0: i32) -> (i32, i32) {
    %c0_i32 = arith.constant 0 : i32
    %c0_i32_0 = arith.constant 0 : i32
    %c0_i32_1 = arith.constant 0 : i32
    return %c0_i32, %c0_i32_0 : i32, i32
  }
  func.func @transform_3(%arg0: i32) -> (i32, i32) {
    %c0_i32 = arith.constant 0 : i32
    %c0_i32_0 = arith.constant 0 : i32
    return %arg0, %c0_i32 : i32, i32
  }
}

module attributes {stable_mosaic.version = 11 : i64} {
  func.func @kernel(%arg0: i32, %arg1: memref<8x2x1xf32, #tpu.memory_space<vmem>>, %arg2: memref<2x10xf32, #tpu.memory_space<vmem>>, %arg3: memref<1x10xf32, #tpu.memory_space<vmem>>, %arg4: memref<1x10xf32, #tpu.memory_space<vmem>>, %arg5: memref<8x2x1xf32, #tpu.memory_space<vmem>>, %arg6: memref<8x2x1xf32, #tpu.memory_space<vmem>>, %arg7: memref<8x2x1xf32, #tpu.memory_space<vmem>>, %arg8: memref<8x2x1xf32, #tpu.memory_space<vmem>>, %arg9: memref<2x6xf32, #tpu.memory_space<vmem>>, %arg10: memref<2x4xf32, #tpu.memory_space<vmem>>, %arg11: memref<8x2x1xf32, #tpu.memory_space<vmem>>) attributes {dimension_semantics = [#tpu.dimension_semantics<arbitrary>], iteration_bounds = array<i64: 1>, scalar_prefetch = 0 : i64, scratch_operands = 0 : i64, tpu.core_type = #tpu.core_type<tc>, window_params = [{pipeline_mode = #tpu.pipeline_mode<synchronous>, transform_indices = @transform_0, window_bounds = array<i64: 8, 2, 1>}, {pipeline_mode = #tpu.pipeline_mode<synchronous>, transform_indices = @transform_1, window_bounds = array<i64: 2, 10>}, {pipeline_mode = #tpu.pipeline_mode<synchronous>, transform_indices = @transform_2, window_bounds = array<i64: 1, 10>}, {pipeline_mode = #tpu.pipeline_mode<synchronous>, transform_indices = @transform_3, window_bounds = array<i64: 1, 10>}, {pipeline_mode = #tpu.pipeline_mode<synchronous>, transform_indices = @transform_4, window_bounds = array<i64: 8, 2, 1>}, {pipeline_mode = #tpu.pipeline_mode<synchronous>, transform_indices = @transform_5, window_bounds = array<i64: 8, 2, 1>}, {pipeline_mode = #tpu.pipeline_mode<synchronous>, transform_indices = @transform_6, window_bounds = array<i64: 8, 2, 1>}, {pipeline_mode = #tpu.pipeline_mode<synchronous>, transform_indices = @transform_7, window_bounds = array<i64: 8, 2, 1>}, {pipeline_mode = #tpu.pipeline_mode<synchronous>, transform_indices = @transform_8, window_bounds = array<i64: 2, 6>}, {pipeline_mode = #tpu.pipeline_mode<synchronous>, transform_indices = @transform_9, window_bounds = array<i64: 2, 4>}, {pipeline_mode = #tpu.pipeline_mode<synchronous>, transform_indices = @transform_10, window_bounds = array<i64: 8, 2, 1>}]} {
    %c0 = arith.constant 0 : index
    %c0_0 = arith.constant 0 : index
    %0 = vector.load %arg3[%c0, %c0_0] : memref<1x10xf32, #tpu.memory_space<vmem>>, vector<1x10xf32>
    %c0_1 = arith.constant 0 : index
    %c0_2 = arith.constant 0 : index
    %1 = vector.load %arg4[%c0_1, %c0_2] : memref<1x10xf32, #tpu.memory_space<vmem>>, vector<1x10xf32>
    %2 = arith.subf %1, %0 : vector<1x10xf32>
    %c0_3 = arith.constant 0 : index
    %c0_4 = arith.constant 0 : index
    %3 = vector.load %arg2[%c0_3, %c0_4] : memref<2x10xf32, #tpu.memory_space<vmem>>, vector<2x10xf32>
    %4 = arith.negf %3 : vector<2x10xf32>
    %5 = math.exp %4 : vector<2x10xf32>
    %cst = arith.constant 1.000000e+00 : f32
    %6 = vector.broadcast %cst : f32 to vector<2x10xf32>
    %7 = arith.addf %6, %5 : vector<2x10xf32>
    %8 = arith.divf %6, %7 : vector<2x10xf32>
    %9 = vector.broadcast %2 : vector<1x10xf32> to vector<2x10xf32>
    %10 = arith.mulf %9, %8 : vector<2x10xf32>
    %11 = vector.broadcast %0 : vector<1x10xf32> to vector<2x10xf32>
    %12 = arith.addf %10, %11 : vector<2x10xf32>
    %13 = vector.extract_strided_slice %12 {offsets = [0, 0], sizes = [2, 6], strides = [1, 1]} : vector<2x10xf32> to vector<2x6xf32>
    %14 = vector.extract_strided_slice %12 {offsets = [0, 6], sizes = [2, 4], strides = [1, 1]} : vector<2x10xf32> to vector<2x4xf32>
    %c0_5 = arith.constant 0 : index
    %c0_6 = arith.constant 0 : index
    %15 = vector.load %arg9[%c0_5, %c0_6] : memref<2x6xf32, #tpu.memory_space<vmem>>, vector<2x6xf32>
    tpu.vector_store %arg9[%c0_5, %c0_6], %13 {strides = array<i32>} : memref<2x6xf32, #tpu.memory_space<vmem>>, vector<2x6xf32>,
    %c0_7 = arith.constant 0 : index
    %c0_8 = arith.constant 0 : index
    %16 = vector.load %arg10[%c0_7, %c0_8] : memref<2x4xf32, #tpu.memory_space<vmem>>, vector<2x4xf32>
    tpu.vector_store %arg10[%c0_7, %c0_8], %14 {strides = array<i32>} : memref<2x4xf32, #tpu.memory_space<vmem>>, vector<2x4xf32>,
    %c0_9 = arith.constant 0 : index
    %c0_10 = arith.constant 0 : index
    %c0_11 = arith.constant 0 : index
    %17 = vector.load %arg1[%c0_9, %c0_10, %c0_11] : memref<8x2x1xf32, #tpu.memory_space<vmem>>, vector<8x2x1xf32>
    %18 = arith.negf %17 : vector<8x2x1xf32>
    %19 = math.exp %18 : vector<8x2x1xf32>
    %cst_12 = arith.constant 1.000000e+00 : f32
    %20 = vector.broadcast %cst_12 : f32 to vector<8x2x1xf32>
    %21 = arith.addf %20, %19 : vector<8x2x1xf32>
    %22 = arith.divf %20, %21 : vector<8x2x1xf32>
    %cst_13 = arith.constant 1.000000e+03 : f32
    %23 = vector.broadcast %cst_13 : f32 to vector<8x2x1xf32>
    %24 = arith.mulf %23, %22 : vector<8x2x1xf32>
    %c0_14 = arith.constant 0 : index
    %c0_15 = arith.constant 0 : index
    %c0_16 = arith.constant 0 : index
    %25 = vector.load %arg11[%c0_14, %c0_15, %c0_16] : memref<8x2x1xf32, #tpu.memory_space<vmem>>, vector<8x2x1xf32>
    tpu.vector_store %arg11[%c0_14, %c0_15, %c0_16], %24 {strides = array<i32>} : memref<8x2x1xf32, #tpu.memory_space<vmem>>, vector<8x2x1xf32>,
    %26 = vector.extract_strided_slice %13 {offsets = [0, 0], sizes = [2, 1], strides = [1, 1]} : vector<2x6xf32> to vector<2x1xf32>
    %27 = vector.extract_strided_slice %13 {offsets = [0, 1], sizes = [2, 1], strides = [1, 1]} : vector<2x6xf32> to vector<2x1xf32>
    %28 = vector.extract_strided_slice %13 {offsets = [0, 2], sizes = [2, 1], strides = [1, 1]} : vector<2x6xf32> to vector<2x1xf32>
    %29 = vector.extract_strided_slice %13 {offsets = [0, 3], sizes = [2, 1], strides = [1, 1]} : vector<2x6xf32> to vector<2x1xf32>
    %30 = vector.extract_strided_slice %13 {offsets = [0, 4], sizes = [2, 1], strides = [1, 1]} : vector<2x6xf32> to vector<2x1xf32>
    %31 = vector.extract_strided_slice %13 {offsets = [0, 5], sizes = [2, 1], strides = [1, 1]} : vector<2x6xf32> to vector<2x1xf32>
    %cst_17 = arith.constant 1.000000e+00 : f32
    %32 = vector.broadcast %cst_17 : f32 to vector<2x1xf32>
    %33 = arith.divf %32, %26 : vector<2x1xf32>
    %34 = arith.mulf %30, %29 : vector<2x1xf32>
    %35 = vector.extract_strided_slice %14 {offsets = [0, 0], sizes = [2, 1], strides = [1, 1]} : vector<2x4xf32> to vector<2x1xf32>
    %36 = vector.extract_strided_slice %14 {offsets = [0, 1], sizes = [2, 1], strides = [1, 1]} : vector<2x4xf32> to vector<2x1xf32>
    %37 = vector.extract_strided_slice %14 {offsets = [0, 2], sizes = [2, 1], strides = [1, 1]} : vector<2x4xf32> to vector<2x1xf32>
    %38 = vector.extract_strided_slice %14 {offsets = [0, 3], sizes = [2, 1], strides = [1, 1]} : vector<2x4xf32> to vector<2x1xf32>
    %c0_18 = arith.constant 0 : index
    %c0_19 = arith.constant 0 : index
    %c0_20 = arith.constant 0 : index
    %39 = vector.load %arg5[%c0_18, %c0_19, %c0_20] : memref<8x2x1xf32, #tpu.memory_space<vmem>>, vector<1x2x1xf32>
    %40 = vector.shape_cast %39 : vector<1x2x1xf32> to vector<2x1xf32>
    %41 = vector.shape_cast %35 : vector<2x1xf32> to vector<1x2x1xf32>
    tpu.vector_store %arg5[%c0_18, %c0_19, %c0_20], %41 {strides = array<i32>} : memref<8x2x1xf32, #tpu.memory_space<vmem>>, vector<1x2x1xf32>,
    %c0_21 = arith.constant 0 : index
    %c0_22 = arith.constant 0 : index
    %c0_23 = arith.constant 0 : index
    %42 = vector.load %arg6[%c0_21, %c0_22, %c0_23] : memref<8x2x1xf32, #tpu.memory_space<vmem>>, vector<1x2x1xf32>
    %43 = vector.shape_cast %42 : vector<1x2x1xf32> to vector<2x1xf32>
    %44 = vector.shape_cast %36 : vector<2x1xf32> to vector<1x2x1xf32>
    tpu.vector_store %arg6[%c0_21, %c0_22, %c0_23], %44 {strides = array<i32>} : memref<8x2x1xf32, #tpu.memory_space<vmem>>, vector<1x2x1xf32>,
    %c0_24 = arith.constant 0 : index
    %c0_25 = arith.constant 0 : index
    %c0_26 = arith.constant 0 : index
    %45 = vector.load %arg7[%c0_24, %c0_25, %c0_26] : memref<8x2x1xf32, #tpu.memory_space<vmem>>, vector<1x2x1xf32>
    %46 = vector.shape_cast %45 : vector<1x2x1xf32> to vector<2x1xf32>
    %47 = vector.shape_cast %37 : vector<2x1xf32> to vector<1x2x1xf32>
    tpu.vector_store %arg7[%c0_24, %c0_25, %c0_26], %47 {strides = array<i32>} : memref<8x2x1xf32, #tpu.memory_space<vmem>>, vector<1x2x1xf32>,
    %c0_27 = arith.constant 0 : index
    %c0_28 = arith.constant 0 : index
    %c0_29 = arith.constant 0 : index
    %48 = vector.load %arg8[%c0_27, %c0_28, %c0_29] : memref<8x2x1xf32, #tpu.memory_space<vmem>>, vector<1x2x1xf32>
    %49 = vector.shape_cast %48 : vector<1x2x1xf32> to vector<2x1xf32>
    %50 = vector.shape_cast %38 : vector<2x1xf32> to vector<1x2x1xf32>
    tpu.vector_store %arg8[%c0_27, %c0_28, %c0_29], %50 {strides = array<i32>} : memref<8x2x1xf32, #tpu.memory_space<vmem>>, vector<1x2x1xf32>,
    %c0_i32 = arith.constant 0 : i32
    %c7_i32 = arith.constant 7 : i32
    %51 = arith.addi %c0_i32, %c7_i32 : i32
    %c1_i32 = arith.constant 1 : i32
    %52:4 = scf.for %arg12 = %c0_i32 to %51 step %c1_i32 iter_args(%arg13 = %35, %arg14 = %36, %arg15 = %37, %arg16 = %38) -> (vector<2x1xf32>, vector<2x1xf32>, vector<2x1xf32>, vector<2x1xf32>)  : i32 {
      %cst_31 = arith.constant 0.000000e+00 : f32
      %53 = vector.broadcast %cst_31 : f32 to vector<2x1xf32>
      %54 = arith.maximumf %arg13, %53 : vector<2x1xf32>
      %cst_32 = arith.constant 0.000000e+00 : f32
      %55 = vector.broadcast %cst_32 : f32 to vector<2x1xf32>
      %56 = arith.maximumf %arg14, %55 : vector<2x1xf32>
      %cst_33 = arith.constant 0.000000e+00 : f32
      %57 = vector.broadcast %cst_33 : f32 to vector<2x1xf32>
      %58 = arith.maximumf %arg15, %57 : vector<2x1xf32>
      %cst_34 = arith.constant 0.000000e+00 : f32
      %59 = vector.broadcast %cst_34 : f32 to vector<2x1xf32>
      %60 = arith.maximumf %arg16, %59 : vector<2x1xf32>
      %61 = arith.index_cast %arg12 : i32 to index
      %c0_35 = arith.constant 0 : index
      %c0_36 = arith.constant 0 : index
      %62 = vector.load %arg11[%61, %c0_35, %c0_36] : memref<8x2x1xf32, #tpu.memory_space<vmem>>, vector<1x2x1xf32>
      %63 = vector.shape_cast %62 : vector<1x2x1xf32> to vector<2x1xf32>
      %cst_37 = arith.constant 0.00857142825 : f32
      %64 = vector.broadcast %cst_37 : f32 to vector<2x1xf32>
      %65 = arith.mulf %63, %64 : vector<2x1xf32>
      %cst_38 = arith.constant 0.000000e+00 : f32
      %66 = vector.broadcast %cst_38 : f32 to vector<2x1xf32>
      %67 = arith.subf %66, %58 : vector<2x1xf32>
      %68 = arith.mulf %67, %33 : vector<2x1xf32>
      %69 = arith.addf %68, %65 : vector<2x1xf32>
      %cst_39 = arith.constant 0.000000e+00 : f32
      %70 = vector.broadcast %cst_39 : f32 to vector<2x1xf32>
      %71 = arith.subf %70, %60 : vector<2x1xf32>
      %72 = arith.mulf %71, %33 : vector<2x1xf32>
      %73 = arith.mulf %58, %33 : vector<2x1xf32>
      %74 = arith.addf %72, %73 : vector<2x1xf32>
      %cst_40 = arith.constant 0.000000e+00 : f32
      %75 = vector.broadcast %cst_40 : f32 to vector<2x1xf32>
      %76 = arith.subf %75, %56 : vector<2x1xf32>
      %77 = arith.mulf %76, %54 : vector<2x1xf32>
      %78 = arith.subf %54, %27 : vector<2x1xf32>
      %79 = arith.mulf %28, %78 : vector<2x1xf32>
      %80 = arith.subf %77, %79 : vector<2x1xf32>
      %81 = arith.mulf %60, %33 : vector<2x1xf32>
      %82 = arith.addf %80, %81 : vector<2x1xf32>
      %cst_41 = arith.constant 0.000000e+00 : f32
      %83 = vector.broadcast %cst_41 : f32 to vector<2x1xf32>
      %84 = arith.subf %83, %30 : vector<2x1xf32>
      %85 = arith.mulf %84, %56 : vector<2x1xf32>
      %86 = arith.subf %54, %27 : vector<2x1xf32>
      %cst_42 = arith.constant 0.000000e+00 : f32
      %87 = vector.broadcast %cst_42 : f32 to vector<2x1xf32>
      %88 = arith.maximumf %86, %87 : vector<2x1xf32>
      %89 = arith.mulf %31, %88 : vector<2x1xf32>
      %90 = arith.mulf %34, %89 : vector<2x1xf32>
      %91 = arith.addf %85, %90 : vector<2x1xf32>
      %cst_43 = arith.constant 5.000000e+00 : f32
      %92 = vector.broadcast %cst_43 : f32 to vector<2x1xf32>
      %93 = arith.mulf %92, %82 : vector<2x1xf32>
      %94 = arith.addf %arg13, %93 : vector<2x1xf32>
      %cst_44 = arith.constant 5.000000e+00 : f32
      %95 = vector.broadcast %cst_44 : f32 to vector<2x1xf32>
      %96 = arith.mulf %95, %91 : vector<2x1xf32>
      %97 = arith.addf %arg14, %96 : vector<2x1xf32>
      %cst_45 = arith.constant 5.000000e+00 : f32
      %98 = vector.broadcast %cst_45 : f32 to vector<2x1xf32>
      %99 = arith.mulf %98, %69 : vector<2x1xf32>
      %100 = arith.addf %arg15, %99 : vector<2x1xf32>
      %cst_46 = arith.constant 5.000000e+00 : f32
      %101 = vector.broadcast %cst_46 : f32 to vector<2x1xf32>
      %102 = arith.mulf %101, %74 : vector<2x1xf32>
      %103 = arith.addf %arg16, %102 : vector<2x1xf32>
      %c1_i32_47 = arith.constant 1 : i32
      %104 = arith.addi %arg12, %c1_i32_47 : i32
      %105 = arith.index_cast %104 : i32 to index
      %c0_48 = arith.constant 0 : index
      %c0_49 = arith.constant 0 : index
      %106 = vector.load %arg5[%105, %c0_48, %c0_49] : memref<8x2x1xf32, #tpu.memory_space<vmem>>, vector<1x2x1xf32>
      %107 = vector.shape_cast %106 : vector<1x2x1xf32> to vector<2x1xf32>
      %108 = vector.shape_cast %94 : vector<2x1xf32> to vector<1x2x1xf32>
      tpu.vector_store %arg5[%105, %c0_48, %c0_49], %108 {strides = array<i32>} : memref<8x2x1xf32, #tpu.memory_space<vmem>>, vector<1x2x1xf32>,
      %c1_i32_50 = arith.constant 1 : i32
      %109 = arith.addi %arg12, %c1_i32_50 : i32
      %110 = arith.index_cast %109 : i32 to index
      %c0_51 = arith.constant 0 : index
      %c0_52 = arith.constant 0 : index
      %111 = vector.load %arg6[%110, %c0_51, %c0_52] : memref<8x2x1xf32, #tpu.memory_space<vmem>>, vector<1x2x1xf32>
      %112 = vector.shape_cast %111 : vector<1x2x1xf32> to vector<2x1xf32>
      %113 = vector.shape_cast %97 : vector<2x1xf32> to vector<1x2x1xf32>
      tpu.vector_store %arg6[%110, %c0_51, %c0_52], %113 {strides = array<i32>} : memref<8x2x1xf32, #tpu.memory_space<vmem>>, vector<1x2x1xf32>,
      %c1_i32_53 = arith.constant 1 : i32
      %114 = arith.addi %arg12, %c1_i32_53 : i32
      %115 = arith.index_cast %114 : i32 to index
      %c0_54 = arith.constant 0 : index
      %c0_55 = arith.constant 0 : index
      %116 = vector.load %arg7[%115, %c0_54, %c0_55] : memref<8x2x1xf32, #tpu.memory_space<vmem>>, vector<1x2x1xf32>
      %117 = vector.shape_cast %116 : vector<1x2x1xf32> to vector<2x1xf32>
      %118 = vector.shape_cast %100 : vector<2x1xf32> to vector<1x2x1xf32>
      tpu.vector_store %arg7[%115, %c0_54, %c0_55], %118 {strides = array<i32>} : memref<8x2x1xf32, #tpu.memory_space<vmem>>, vector<1x2x1xf32>,
      %c1_i32_56 = arith.constant 1 : i32
      %119 = arith.addi %arg12, %c1_i32_56 : i32
      %120 = arith.index_cast %119 : i32 to index
      %c0_57 = arith.constant 0 : index
      %c0_58 = arith.constant 0 : index
      %121 = vector.load %arg8[%120, %c0_57, %c0_58] : memref<8x2x1xf32, #tpu.memory_space<vmem>>, vector<1x2x1xf32>
      %122 = vector.shape_cast %121 : vector<1x2x1xf32> to vector<2x1xf32>
      %123 = vector.shape_cast %103 : vector<2x1xf32> to vector<1x2x1xf32>
      tpu.vector_store %arg8[%120, %c0_57, %c0_58], %123 {strides = array<i32>} : memref<8x2x1xf32, #tpu.memory_space<vmem>>, vector<1x2x1xf32>,
      scf.yield %94, %97, %100, %103 : vector<2x1xf32>, vector<2x1xf32>, vector<2x1xf32>, vector<2x1xf32>
    }
    %c7_i32_30 = arith.constant 7 : i32
    return
  }
  func.func @transform_0(%arg0: i32) -> (i32, i32, i32) {
    %c0_i32 = arith.constant 0 : i32
    %c0_i32_0 = arith.constant 0 : i32
    %c0_i32_1 = arith.constant 0 : i32
    %c0_i32_2 = arith.constant 0 : i32
    return %c0_i32, %c0_i32_0, %c0_i32_1 : i32, i32, i32
  }
  func.func @transform_1(%arg0: i32) -> (i32, i32) {
    %c0_i32 = arith.constant 0 : i32
    %c0_i32_0 = arith.constant 0 : i32
    %c0_i32_1 = arith.constant 0 : i32
    return %c0_i32, %c0_i32_0 : i32, i32
  }
  func.func @transform_2(%arg0: i32) -> (i32, i32) {
    %c0_i32 = arith.constant 0 : i32
    %c0_i32_0 = arith.constant 0 : i32
    %c0_i32_1 = arith.constant 0 : i32
    return %c0_i32, %c0_i32_0 : i32, i32
  }
  func.func @transform_3(%arg0: i32) -> (i32, i32) {
    %c0_i32 = arith.constant 0 : i32
    %c0_i32_0 = arith.constant 0 : i32
    %c0_i32_1 = arith.constant 0 : i32
    return %c0_i32, %c0_i32_0 : i32, i32
  }
  func.func @transform_4(%arg0: i32) -> (i32, i32, i32) {
    %c0_i32 = arith.constant 0 : i32
    %c0_i32_0 = arith.constant 0 : i32
    %c0_i32_1 = arith.constant 0 : i32
    %c0_i32_2 = arith.constant 0 : i32
    return %c0_i32, %c0_i32_0, %c0_i32_1 : i32, i32, i32
  }
  func.func @transform_5(%arg0: i32) -> (i32, i32, i32) {
    %c0_i32 = arith.constant 0 : i32
    %c0_i32_0 = arith.constant 0 : i32
    %c0_i32_1 = arith.constant 0 : i32
    %c0_i32_2 = arith.constant 0 : i32
    return %c0_i32, %c0_i32_0, %c0_i32_1 : i32, i32, i32
  }
  func.func @transform_6(%arg0: i32) -> (i32, i32, i32) {
    %c0_i32 = arith.constant 0 : i32
    %c0_i32_0 = arith.constant 0 : i32
    %c0_i32_1 = arith.constant 0 : i32
    %c0_i32_2 = arith.constant 0 : i32
    return %c0_i32, %c0_i32_0, %c0_i32_1 : i32, i32, i32
  }
  func.func @transform_7(%arg0: i32) -> (i32, i32, i32) {
    %c0_i32 = arith.constant 0 : i32
    %c0_i32_0 = arith.constant 0 : i32
    %c0_i32_1 = arith.constant 0 : i32
    %c0_i32_2 = arith.constant 0 : i32
    return %c0_i32, %c0_i32_0, %c0_i32_1 : i32, i32, i32
  }
  func.func @transform_8(%arg0: i32) -> (i32, i32) {
    %c0_i32 = arith.constant 0 : i32
    %c0_i32_0 = arith.constant 0 : i32
    %c0_i32_1 = arith.constant 0 : i32
    return %c0_i32, %c0_i32_0 : i32, i32
  }
  func.func @transform_9(%arg0: i32) -> (i32, i32) {
    %c0_i32 = arith.constant 0 : i32
    %c0_i32_0 = arith.constant 0 : i32
    %c0_i32_1 = arith.constant 0 : i32
    return %c0_i32, %c0_i32_0 : i32, i32
  }
  func.func @transform_10(%arg0: i32) -> (i32, i32, i32) {
    %c0_i32 = arith.constant 0 : i32
    %c0_i32_0 = arith.constant 0 : i32
    %c0_i32_1 = arith.constant 0 : i32
    %c0_i32_2 = arith.constant 0 : i32
    return %c0_i32, %c0_i32_0, %c0_i32_1 : i32, i32, i32
  }
}

</mosaic_0001>

<bundles_post_ra>
// kernel: mechanistic_autoencoder_forward.10
= control target key start
LH: loop header
LB: loop body
LE: loop exit
PB: predicated region body
PF: predicated region fallthrough
CT: control target
= control target key end

     0   :  { %vm17_vm0 = vcmask 31744   ;;  %v130_v1 = vmov 0.0   ;;  %vm37_vm2 = vcmask 1043456   ;;  %vm131_vm3 = vmmov 0   ;;  %s167_s0 = inlined_call_operand.vmem [shape: f32[8,4], index: 0, kind: input, shape index: {}]   ;;  %s168_s1 = inlined_call_operand.vmem [shape: f32[4,128], index: 1, kind: input, shape index: {}]   ;;  %s169_s2 = inlined_call_operand.vmem [shape: f32[1,128], index: 2, kind: input, shape index: {}]   ;;  %s170_s3 = inlined_call_operand.vmem [shape: f32[8,128], index: 3, kind: output, shape index: {}]  }
   0x1   :  { %v14_v0 = vld [vmem:[%s167_s0] sm:$0xff]  ;;  %122 = vmatprep.subr.mxu0 %v130_v1  ;;  %124 = vmatprep.mubr.msk.f32.mxu0 %vm131_vm3, %v130_v1  ;;  %vm132_vm5 = vmmov 1  }
   0x2   :  { %vm15_vm1 = vcmp.ne.f32.partialorder %v14_v0, %v14_v0  ;;  %v26_v4 = vld [vmem:[%s168_s1] sm:$0xf] }
   0x3   :  { %v16_v2 = vsel %vm15_vm1, 1.0, %v130_v1  ;;  %123 = vmatpush3.msk.msra.mxu0 %vm37_vm2, %v26_v4  ;;  %v117_v7 = vld [vmem:[%s169_s2] ss:$0 sm:$0xff] }
   0x4   :  { %v18_v3 = vsel %vm17_vm0, %v16_v2, -inf }
   0x5   :  { %19 = vmax.xlane.f32.xlu0 %v18_v3 }
  0x92   :  { %v20_v5 = vpop.xlane.xlu0 %19 }
  0x93   :  { %vm21_vm4 = vcmp.gt.f32.partialorder %v20_v5, 0.0 }
  0x94   :  { %vm22_vm6 = vmxor %vm21_vm4, %vm132_vm5 }
  0x95   :  { %v25_v6 = vsel %vm22_vm6, %v14_v0, 0.0 }
  0x96   :  { %125 = vmatmul.mubr.msk.f32.vlgmr.msra.gmra.mrb[0].mxu0 %vm17_vm0, %v25_v6 }
 0x169   :  { %v107_v8 = vpop.f32.mrb[0].mxu0 }
 0x16a   :  { %v108_v9 = vadd.f32 %v117_v7, %v107_v8  ;;  %v126_v10 = vpop.f32.mrb[1].mxu0 }
 0x16c   :  { %v111_v11 = vsel %vm22_vm6, %v108_v9, 0.0 }
 0x16d   :  { %112 = vst [vmem:[%s170_s3] sm:$0xff] %v111_v11 }

// kernel: mechanistic_autoencoder_forward.9
= control target key start
LH: loop header
LB: loop body
LE: loop exit
PB: predicated region body
PF: predicated region fallthrough
CT: control target
= control target key end

     0   :  { %vm20_vm0 = vcmask 23552   ;;  %v152_v2 = vmov 0.0   ;;  %vm51_vm3 = vcmask 1042432   ;;  %vm153_vm5 = vmmov 1   ;;  %s204_s0 = inlined_call_operand.vmem [shape: f32[16,3], index: 0, kind: input, shape index: {}]   ;;  %s205_s1 = inlined_call_operand.vmem [shape: f32[3,128], index: 1, kind: input, shape index: {}]   ;;  %s206_s2 = inlined_call_operand.vmem [shape: f32[1,128], index: 2, kind: input, shape index: {}]   ;;  %s207_s3 = inlined_call_operand.vmem [shape: f32[16,128], index: 3, kind: output, shape index: {}]  }
   0x1   :  { %v14_v0 = vld [vmem:[%s204_s0] sm:$0xff]  ;;  %v15_v1 = vld [vmem:[%s204_s0 + $0x8] sm:$0xff] }
   0x2   :  { %vm16_vm1 = vcmp.ne.f32.partialorder %v14_v0, %v14_v0  ;;  %vm17_vm2 = vcmp.ne.f32.partialorder %v15_v1, %v15_v1  ;;  %v37_v7 = vld [vmem:[%s205_s1] sm:$0x7] }
   0x3   :  { %v18_v3 = vsel %vm16_vm1, 1.0, %v152_v2  ;;  %v19_v4 = vsel %vm17_vm2, 1.0, %v152_v2  ;;  %145 = vmatprep.subr.msk.mxu0 %vm51_vm3, %v37_v7  ;;  %v138_v13 = vld [vmem:[%s206_s2] ss:$0 sm:$0xff] }
   0x4   :  { %v21_v5 = vsel %vm20_vm0, %v18_v3, -inf  ;;  %v24_v6 = vsel %vm20_vm0, %v19_v4, -inf  ;;  %146 = vmatpush3.msk.msra.mxu0 %vm51_vm3, %v37_v7 }
   0x5   :  { %22 = vmax.xlane.f32.xlu0 %v21_v5 }
   0x9   :  { %25 = vmax.xlane.f32.xlu0 %v24_v6 }
  0x92   :  { %v23_v8 = vpop.xlane.xlu0 %22 }
  0x93   :  { %vm27_vm4 = vcmp.gt.f32.partialorder %v23_v8, 0.0 }
  0x94   :  { %vm185_vm6 = vmxor %vm27_vm4, %vm153_vm5 }
  0x95   :  { %v35_v10 = vsel %vm185_vm6, %v14_v0, 0.0 }
  0x96   :  { %147 = vmatprep.mubr.msk.f32.mxu0 %vm20_vm0, %v35_v10  ;;  %v26_v11 = vpop.xlane.xlu0 %25 }
  0x97   :  { %vm28_vm7 = vcmp.gt.f32.partialorder %v26_v11, 0.0 }
  0x98   :  { %vm30_vm8 = vmxor %vm28_vm7, %vm153_vm5 }
  0x99   :  { %v36_v12 = vsel %vm30_vm8, %v15_v1, 0.0 }
  0x9a   :  { %148 = vmatmul.mubr.msk.f32.vlgmr.msra.gmra.mrb[0].mxu0 %vm20_vm0, %v36_v12 }
 0x16d   :  { %v149_v14 = vpop.f32.mrb[0].mxu0 }
 0x16e   :  { %v127_v15 = vadd.f32 %v149_v14, %v138_v13  ;;  %v121_v16 = vpop.f32.mrb[1].mxu0 }
 0x16f   :  { %v122_v17 = vadd.f32 %v138_v13, %v121_v16 }
 0x170   :  { %v131_v18 = vsel %vm30_vm8, %v127_v15, 0.0 }
 0x171   :  { %133 = vst [vmem:[%s207_s3 + $0x8] sm:$0xff] %v131_v18  ;;  %v130_v19 = vsel %vm185_vm6, %v122_v17, 0.0 }
 0x172   :  { %132 = vst [vmem:[%s207_s3] sm:$0xff] %v130_v19 }

// kernel: mechanistic_autoencoder_forward.11
= control target key start
LH: loop header
LB: loop body
LE: loop exit
PB: predicated region body
PF: predicated region fallthrough
CT: control target
= control target key end

     0   :  { %v146_v3 = vmov 0.0   ;;  %vm41_vm0 = vcmask 1042432   ;;  %vm34_vm1 = vcmask 154624   ;;  %v24_v11 = vlaneseq  ;;  %s206_s1 = inlined_call_operand.vmem [shape: f32[19,256], index: 1, kind: input, shape index: {}]   ;;  %s207_s0 = inlined_call_operand.vmem [shape: f32[16,19], index: 0, kind: input, shape index: {}]   ;;  %s208_s2 = inlined_call_operand.vmem [shape: f32[1,256], index: 2, kind: input, shape index: {}]   ;;  %s209_s3 = inlined_call_operand.vmem [shape: f32[16,256], index: 3, kind: output, shape index: {}]  }
   0x1   :  { %v17_v0 = vld [vmem:[%s206_s1 + $0x8] sm:$0xff]  ;;  %v19_v1 = vld [vmem:[%s206_s1 + $0x18] sm:$0xff]  ;;  %v16_v2 = vld [vmem:[%s206_s1] sm:$0xff]  ;;  %112 = vmatprep.mubr.f32.mxu0 %v146_v3  ;;  %118 = vmatprep.mubr.f32.mxu1 %v146_v3 }
   0x2   :  { %v137_v4 = vpack.c.bf16 %v19_v1, %v17_v0  ;;  %v18_v5 = vld [vmem:[%s206_s1 + $0x10] sm:$0xff]  ;;  %v21_v7 = vld [vmem:[%s206_s1 + $0x28] sm:$0x7]  ;;  %v20_v8 = vld [vmem:[%s206_s1 + $0x20] sm:$0x7]  ;;  %v25_v12 = vshrl.u32 %v24_v11, 7 }
   0x3   :  { %v139_v6 = vpack.c.bf16 %v18_v5, %v16_v2  ;;  %v14_v9 = vld [vmem:[%s207_s0] sm:$0xff]  ;;  %v15_v10 = vld [vmem:[%s207_s0 + $0x8] sm:$0xff] }
   0x4   :  { %138 = vmatprep.subr.bf16.mxu0 %v137_v4  ;;  %141 = vmatprep.subr.bf16.mxu1 %v137_v4  ;;  %v26_v13 = vsub.s32 0, %v25_v12  ;;  %v22_v14 = vld [vmem:[%s208_s2] sm:$0x3]  ;;  %v30_v15 = vsub.s32 1, %v25_v12 }
   0x5   :  { %140 = vmatpush1.bf16.msra.mxu0 %v139_v6  ;;  %143 = vmatpush1.bf16.msra.mxu1 %v139_v6 }
   0x6   :  { %133 = vmatprep.subr.msk.mxu0 %vm41_vm0, %v21_v7  ;;  %142 = vmatprep.subr.msk.mxu1 %vm41_vm0, %v21_v7  ;;  %v27_v16 = vrot.slane %v22_v14, %v26_v13  ;;  %v31_v17 = vrot.slane %v22_v14, %v30_v15 }
   0x9   :  { %134 = vmatpush1.msk.msra.mxu0 %vm41_vm0, %v20_v8  ;;  %144 = vmatpush1.msk.msra.mxu1 %vm41_vm0, %v20_v8 }
   0xa   :  { %135 = vmatmul.mubr.msk.f32.vlgmr.msra.gmra.mrb[0].mxu0 %vm34_vm1, %v14_v9  ;;  %136 = vmatmul.mubr.msk.f32.vlgmr.msra.gmra.mrb[0].mxu1 %vm34_vm1, %v15_v10 }
  0xdd   :  { %v114_v18 = vpop.f32.mrb[0].mxu0  ;;  %v120_v19 = vpop.f32.mrb[0].mxu1 }
  0xde   :  { %v115_v20 = vadd.f32 %v114_v18, %v27_v16  ;;  %v121_v21 = vadd.f32 %v120_v19, %v27_v16  ;;  %v116_v22 = vpop.f32.mrb[1].mxu0  ;;  %v122_v23 = vpop.f32.mrb[1].mxu1 }
  0xdf   :  { %v117_v24 = vadd.f32 %v116_v22, %v31_v17  ;;  %v123_v25 = vadd.f32 %v122_v23, %v31_v17 }
  0xe0   :  { %125 = vst [vmem:[%s209_s3] sm:$0xff] %v115_v20  ;;  %127 = vst [vmem:[%s209_s3 + $0x10] sm:$0xff] %v121_v21 }
  0xe1   :  { %126 = vst [vmem:[%s209_s3 + $0x8] sm:$0xff] %v117_v24  ;;  %128 = vst [vmem:[%s209_s3 + $0x18] sm:$0xff] %v123_v25 }

// kernel: mechanistic_autoencoder_forward.12
= control target key start
LH: loop header
LB: loop body
LE: loop exit
PB: predicated region body
PF: predicated region fallthrough
CT: control target
= control target key end

     0   :  { %s590_s12 = smov 0   ;;  %s643_s0 = inlined_call_operand.vmem [shape: f32[2,8,2,128], index: 0, kind: input, shape index: {}]   ;;  %s644_s1 = inlined_call_operand.vmem [shape: f32[2,32,128], index: 1, kind: input, shape index: {}]   ;;  %s645_s2 = inlined_call_operand.vmem [shape: f32[2,8,2,32], index: 2, kind: output, shape index: {0}]   ;;  %s646_s3 = inlined_call_operand.vmem [shape: f32[2,2,32], index: 3, kind: output, shape index: {1}]  }
   0x1 LB: > { %s444_s13 = sadd.s32 4294967295, %s550_s12   ;;  %p448_p0 = scmp.ge.s32.totalorder %s550_s12, 1  ;;  %s550_s12 = sphi %s590_s12, %s14_s12  }
   0x2   : > { %p150_p1 = scmp.lt.s32.totalorder %s550_s12, 3 }
   0x4   : > { %p151_p2 = pnand %p448_p0, %p150_p1 }
   0x5   : > { %p183_p3 = scmp.lt.s32.totalorder (!%p151_p2), %s444_s13, 1  ;;  %v552_v4 = vmov (!%p151_p2), 0.0   ;;  %v556_v5 = vmov (!%p151_p2), 0.0   ;;  %s622_s29 = smov (!%p151_p2), 0  }
   0x6   : > { %154 = sbr.rel (%p151_p2) target bundleno = 841 (0x349), region = 28 }
   0xd   : > { %s648_s13 = smov (!%p183_p3, %s444_s13), 1 }
   0xe   : > { %s461_s14 = sshll.u32 %s648_s13, 4  ;;  %s462_s15 = sshll.u32 %s648_s13, 5 }
   0xf   : > { %s601_s18 = scalar_lea.vmem %s643_s0, %s461_s14  ;;  %s192_s21 = scalar_lea.vmem %s644_s1, %s462_s15 }
  0x10   : > { %s609_s24 = scalar_lea.vmem %s645_s2, %s461_s14  ;;  %s455_s25 = sshll.u32 %s648_s13, 1  ;;  %v611_v0 = vld [vmem:[%s192_s21] sm:$0xff]  ;;  %v613_v1 = vld [vmem:[%s192_s21 + $0x8] sm:$0xff]  ;;  %v615_v2 = vld [vmem:[%s192_s21 + $0x10] sm:$0xff] }
  0x11   : > { %s620_s28 = scalar_lea.vmem %s646_s3, %s455_s25  ;;  %v205_v3 = vld [vmem:[%s192_s21 + $0x18] sm:$0xff] }
  0x12 LB: >> { %v481_v6 = vpack.c.bf16 %v613_v1, %v611_v0  ;;  %v564_v7 = vmov 0.0|0.0   ;;  %s565_s30 = smov 32   ;;  %v484_v8 = vpack.c.bf16 %v205_v3, %v615_v2  ;;  %vm566_vm0 = vmmov 0   ;;  %s456_s4 = sshll.u32 %s562_s29, 1  ;;  %s562_s29 = sphi %s622_s29, %s211_s29   ;;  %v558_v5 = vphi %v556_v5, %v317_v5   ;;  %v554_v4 = vphi %v552_v4, %v553_v4  }
  0x13   : >> { %480 = vmatprep.subr.bf16.mxu0 %v564_v7  ;;  %218 = vrot.lane.b32.xlu0 %v558_v5, %s565_s30  ;;  %v567_v9 = vmov 0.0   ;;  %vm220_vm1 = vcmask 261120   ;;  %s215_s5 = scalar_lea.vmem %s601_s18, %s456_s4  ;;  %s568_s6 = smov 64   ;;  %vm323_vm2 = vcmask 254976  }
  0x14   : >> { %482 = vmatpush3.bf16.msra.mxu0 %v481_v6  ;;  %477 = vmatprep.mubr.msk.f32.mxu0 %vm566_vm0, %v567_v9  ;;  %v216_v11 = vld [vmem:[%s215_s5] sm:$0x3]  ;;  %s322_s7 = scalar_lea.vmem %s609_s24, %s456_s4  ;;  %s211_s29 = sadd.s32 1, %s562_s29  }
  0x15   : >> { %483 = vmatprep.subr.bf16.mxu0 %v564_v7  ;;  %p208_p4 = scmp.ge.s32.totalorder %s211_s29, 8  }
  0x16   : > { %s569_s8 = smov (%p208_p4), 96  }
  0x18   : >> { %485 = vmatpush3.bf16.msra.mxu0 %v484_v8 }
  0x85   : >> { %v219_v10 = vpop.permute.xlu0 %218 }
  0x86   : >> { %478 = vmatmul.mubr.msk.f32.vlgmr.msra.gmra.mrb[0].mxu0 %vm220_vm1, %v219_v10 }
 0x159   : >> { %v289_v12 = vpop.f32.mrb[0].mxu0 }
 0x15a   : >> { %v293_v13 = vadd.f32 %v289_v12, %v216_v11  ;;  %v479_v14 = vpop.f32.mrb[1].mxu0 }
 0x15c   : >> { %524 = vtanh.f32 %v293_v13  ;;  %v458_v16 = vmul.f32 -1.442695, %v293_v13 }
 0x15e   : >> { %526 = vpow2.f32 %v458_v16 }
 0x166   : >> { %v525_v15 = vpop.eup %524 }
 0x167   : >> { %303 = vrot.lane.b32.xlu0 %v525_v15, %s568_s6 }
 0x168   : >> { %v527_v17 = vpop.eup %526 }
 0x169   : >> { %v297_v18 = vadd.f32 1.0, %v527_v17 }
 0x16b   : >> { %528 = vrcp.f32 %v297_v18 }
 0x175   : >> { %v529_v19 = vpop.eup %528 }
 0x176   : >> { %v301_v22 = vmul.f32 %v554_v4, %v529_v19 }
 0x1d9   : >> { %v304_v20 = vpop.permute.xlu0 %303 }
 0x1da   : >> { %v306_v21 = vmul.f32 %v529_v19, %v304_v20 }
 0x1dc   : >> { %308 = vrot.lane.b32.xlu1 %v306_v21, %s565_s30 }
 0x24e   : >> { %v309_v23 = vpop.permute.xlu1 %308 }
 0x24f   : >> { %v311_v24 = vadd.f32 %v309_v23, %v301_v22  }
 0x251   : >> { %530 = vtanh.f32 %v311_v24  ;;  %v553_v4 = vmov %v311_v24  }
 0x25b   : >> { %v531_v25 = vpop.eup %530 }
 0x25c   : >> { %314 = vrot.lane.b32.xlu1 %v531_v25, %s568_s6 }
 0x2ce   : >> { %v315_v26 = vpop.permute.xlu1 %314 }
 0x2cf   : >> { %v317_v5 = vmul.f32 %v529_v19, %v315_v26  }
 0x2d1   : >> { %319 = vrot.lane.b32.xlu0 %v317_v5, %s565_s30 }
 0x2d5   : > { %326 = vrot.lane.b32.xlu0 (%p208_p4), %v311_v24, %s569_s8 }
 0x33e   : > { %210 = sbr.rel (!%p208_p4) target bundleno = 18 (0x12), region = 82 }
 0x343   : >> { %v320_v27 = vpop.permute.xlu0 %319 }
 0x344   : >> { %324 = vst.msk [vmem:[%s322_s7] sm:$0x3] %vm323_vm2, %v320_v27 }
 0x347   : > { %v327_v28 = vpop.permute.xlu0 %326 }
 0x348   : > { %330 = vst.msk [vmem:[%s620_s28] sm:$0x3] %vm323_vm2, %v327_v28 }
 0x349 PF: > { %s14_s12 = sadd.s32 1, %s550_s12  }
 0x34a   : > { %p11_p5 = scmp.ge.s32.totalorder %s14_s12, 4  }
 0x34c   :  { %13 = sbr.rel (!%p11_p5) target bundleno = 1 (0x1), region = 93 }

// kernel: mechanistic_autoencoder_forward.13
= control target key start
LH: loop header
LB: loop body
LE: loop exit
PB: predicated region body
PF: predicated region fallthrough
CT: control target
= control target key end

     0   :  { %v163_v3 = vmov 0.0   ;;  %vm44_vm0 = vcmask 523264   ;;  %v34_v27 = vlaneseq  ;;  %s253_s1 = inlined_call_operand.vmem [shape: f32[64,256], index: 1, kind: input, shape index: {}]   ;;  %s254_s0 = inlined_call_operand.vmem [shape: f32[16,64], index: 0, kind: input, shape index: {}]   ;;  %s255_s2 = inlined_call_operand.vmem [shape: f32[1,256], index: 2, kind: input, shape index: {}]   ;;  %s256_s3 = inlined_call_operand.vmem [shape: f32[16,256], index: 3, kind: output, shape index: {}]  }
   0x1   :  { %v17_v0 = vld [vmem:[%s253_s1 + $0x8] sm:$0xff]  ;;  %v19_v1 = vld [vmem:[%s253_s1 + $0x18] sm:$0xff]  ;;  %v16_v2 = vld [vmem:[%s253_s1] sm:$0xff]  ;;  %115 = vmatprep.mubr.f32.mxu0 %v163_v3  ;;  %121 = vmatprep.mubr.f32.mxu1 %v163_v3 }
   0x2   :  { %v138_v4 = vpack.c.bf16 %v19_v1, %v17_v0  ;;  %v18_v5 = vld [vmem:[%s253_s1 + $0x10] sm:$0xff]  ;;  %v21_v6 = vld [vmem:[%s253_s1 + $0x28] sm:$0xff]  ;;  %v23_v7 = vld [vmem:[%s253_s1 + $0x38] sm:$0xff]  ;;  %v35_v28 = vshrl.u32 %v34_v27, 7 }
   0x3   :  { %v140_v8 = vpack.c.bf16 %v18_v5, %v16_v2  ;;  %v142_v9 = vpack.c.bf16 %v23_v7, %v21_v6  ;;  %v20_v10 = vld [vmem:[%s253_s1 + $0x20] sm:$0xff]  ;;  %v22_v11 = vld [vmem:[%s253_s1 + $0x30] sm:$0xff]  ;;  %v25_v12 = vld [vmem:[%s253_s1 + $0x48] sm:$0xff] }
   0x4   :  { %139 = vmatprep.subr.bf16.mxu0 %v138_v4  ;;  %154 = vmatprep.subr.bf16.mxu1 %v138_v4  ;;  %v27_v13 = vld [vmem:[%s253_s1 + $0x58] sm:$0xff]  ;;  %v144_v14 = vpack.c.bf16 %v22_v11, %v20_v10  ;;  %v24_v16 = vld [vmem:[%s253_s1 + $0x40] sm:$0xff]  ;;  %v26_v17 = vld [vmem:[%s253_s1 + $0x50] sm:$0xff]  ;;  %v36_v29 = vsub.s32 0, %v35_v28  ;;  %v40_v31 = vsub.s32 1, %v35_v28 }
   0x5   :  { %141 = vmatpush1.bf16.msra.mxu0 %v140_v8  ;;  %158 = vmatpush1.bf16.msra.mxu1 %v140_v8  ;;  %v146_v15 = vpack.c.bf16 %v27_v13, %v25_v12  ;;  %v29_v18 = vld [vmem:[%s253_s1 + $0x68] sm:$0xff]  ;;  %v31_v19 = vld [vmem:[%s253_s1 + $0x78] sm:$0xff]  ;;  %v148_v20 = vpack.c.bf16 %v26_v17, %v24_v16  ;;  %v28_v22 = vld [vmem:[%s253_s1 + $0x60] sm:$0xff] }
   0x6   :  { %143 = vmatprep.subr.bf16.mxu0 %v142_v9  ;;  %155 = vmatprep.subr.bf16.mxu1 %v142_v9  ;;  %v150_v21 = vpack.c.bf16 %v31_v19, %v29_v18  ;;  %v30_v23 = vld [vmem:[%s253_s1 + $0x70] sm:$0xff]  ;;  %v14_v25 = vld [vmem:[%s254_s0] sm:$0xff]  ;;  %v15_v26 = vld [vmem:[%s254_s0 + $0x8] sm:$0xff] }
   0x7   :  { %v152_v24 = vpack.c.bf16 %v30_v23, %v28_v22  ;;  %v32_v30 = vld [vmem:[%s255_s2] sm:$0x3] }
   0x8   :  { %v37_v32 = vrot.slane %v32_v30, %v36_v29  ;;  %v41_v33 = vrot.slane %v32_v30, %v40_v31 }
   0x9   :  { %145 = vmatpush1.bf16.msra.mxu0 %v144_v14  ;;  %159 = vmatpush1.bf16.msra.mxu1 %v144_v14 }
   0xa   :  { %147 = vmatprep.subr.bf16.mxu0 %v146_v15  ;;  %156 = vmatprep.subr.bf16.mxu1 %v146_v15 }
   0xd   :  { %149 = vmatpush1.bf16.msra.mxu0 %v148_v20  ;;  %160 = vmatpush1.bf16.msra.mxu1 %v148_v20 }
   0xe   :  { %151 = vmatprep.subr.bf16.mxu0 %v150_v21  ;;  %157 = vmatprep.subr.bf16.mxu1 %v150_v21 }
  0x11   :  { %153 = vmatpush1.bf16.msra.mxu0 %v152_v24  ;;  %161 = vmatpush1.bf16.msra.mxu1 %v152_v24 }
  0x14   :  { %136 = vmatmul.mubr.msk.f32.vlgmr.msra.gmra.mrb[0].mxu0 %vm44_vm0, %v14_v25  ;;  %137 = vmatmul.mubr.msk.f32.vlgmr.msra.gmra.mrb[0].mxu1 %vm44_vm0, %v15_v26 }
  0xe7   :  { %v117_v34 = vpop.f32.mrb[0].mxu0  ;;  %v123_v35 = vpop.f32.mrb[0].mxu1 }
  0xe8   :  { %v118_v36 = vadd.f32 %v117_v34, %v37_v32  ;;  %v124_v37 = vadd.f32 %v123_v35, %v37_v32  ;;  %v119_v38 = vpop.f32.mrb[1].mxu0  ;;  %v125_v39 = vpop.f32.mrb[1].mxu1 }
  0xe9   :  { %v120_v40 = vadd.f32 %v119_v38, %v41_v33  ;;  %v126_v41 = vadd.f32 %v125_v39, %v41_v33 }
  0xea   :  { %128 = vst [vmem:[%s256_s3] sm:$0xff] %v118_v36  ;;  %130 = vst [vmem:[%s256_s3 + $0x10] sm:$0xff] %v124_v37 }
  0xeb   :  { %129 = vst [vmem:[%s256_s3 + $0x8] sm:$0xff] %v120_v40  ;;  %131 = vst [vmem:[%s256_s3 + $0x18] sm:$0xff] %v126_v41 }

// kernel: mechanistic_autoencoder_forward.15
= control target key start
LH: loop header
LB: loop body
LE: loop exit
PB: predicated region body
PF: predicated region fallthrough
CT: control target
= control target key end

     0   :  { %vm31_vm0 = vcmask 523264   ;;  %s228_s1 = inlined_call_operand.vmem [shape: f32[64,128], index: 1, kind: input, shape index: {}]   ;;  %s229_s0 = inlined_call_operand.vmem [shape: f32[16,64], index: 0, kind: input, shape index: {}]   ;;  %s230_s2 = inlined_call_operand.vmem [shape: f32[1,128], index: 2, kind: input, shape index: {}]   ;;  %s231_s3 = inlined_call_operand.vmem [shape: f32[16,128], index: 3, kind: output, shape index: {}]  }
   0x1   :  { %v16_v0 = vld [vmem:[%s228_s1] sm:$0xff]  ;;  %v17_v1 = vld [vmem:[%s228_s1 + $0x8] sm:$0xff]  ;;  %v18_v2 = vld [vmem:[%s228_s1 + $0x10] sm:$0xff] }
   0x2   :  { %v151_v3 = vpack.c.bf16 %v17_v1, %v16_v0  ;;  %v19_v4 = vld [vmem:[%s228_s1 + $0x18] sm:$0xff]  ;;  %v20_v6 = vld [vmem:[%s228_s1 + $0x20] sm:$0xff]  ;;  %v21_v7 = vld [vmem:[%s228_s1 + $0x28] sm:$0xff] }
   0x3   :  { %v155_v5 = vpack.c.bf16 %v19_v4, %v18_v2  ;;  %v14_v8 = vld [vmem:[%s229_s0] sm:$0xff]  ;;  %v159_v9 = vpack.c.bf16 %v21_v7, %v20_v6  ;;  %v22_v10 = vld [vmem:[%s228_s1 + $0x30] sm:$0xff]  ;;  %v23_v11 = vld [vmem:[%s228_s1 + $0x38] sm:$0xff] }
   0x4   :  { %152 = vmatprep.subr.bf16.mxu0 %v151_v3  ;;  %148 = vmatprep.mubr.msk.f32.mxu0 %vm31_vm0, %v14_v8  ;;  %v163_v12 = vpack.c.bf16 %v23_v11, %v22_v10  ;;  %v15_v13 = vld [vmem:[%s229_s0 + $0x8] sm:$0xff]  ;;  %v119_v14 = vld [vmem:[%s230_s2] ss:$0 sm:$0xff] }
   0x5   :  { %154 = vmatpush3.bf16.msra.mxu0 %v151_v3 }
   0x6   :  { %156 = vmatprep.subr.bf16.mxu0 %v155_v5 }
   0x9   :  { %158 = vmatpush3.bf16.msra.mxu0 %v155_v5 }
   0xa   :  { %160 = vmatprep.subr.bf16.mxu0 %v159_v9 }
   0xd   :  { %162 = vmatpush3.bf16.msra.mxu0 %v159_v9 }
   0xe   :  { %164 = vmatprep.subr.bf16.mxu0 %v163_v12 }
  0x11   :  { %166 = vmatpush3.bf16.msra.mxu0 %v163_v12 }
  0x14   :  { %149 = vmatmul.mubr.msk.f32.vlgmr.msra.gmra.mrb[0].mxu0 %vm31_vm0, %v15_v13 }
  0xe7   :  { %v150_v15 = vpop.f32.mrb[0].mxu0 }
  0xe8   :  { %v110_v16 = vadd.f32 %v150_v15, %v119_v14  ;;  %v104_v17 = vpop.f32.mrb[1].mxu0 }
  0xe9   :  { %v105_v18 = vadd.f32 %v119_v14, %v104_v17 }
  0xea   :  { %114 = vst [vmem:[%s231_s3 + $0x8] sm:$0xff] %v110_v16 }
  0xeb   :  { %113 = vst [vmem:[%s231_s3] sm:$0xff] %v105_v18 }

// kernel: mechanistic_autoencoder_forward.16
= control target key start
LH: loop header
LB: loop body
LE: loop exit
PB: predicated region body
PF: predicated region fallthrough
CT: control target
= control target key end

     0   :  { %v193_v0 = vmov 0.0|0.0   ;;  %vm194_vm0 = vmmov 0   ;;  %v195_v4 = vmov 0.0   ;;  %s273_s1 = inlined_call_operand.vmem [shape: f32[128,128], index: 1, kind: input, shape index: {}]   ;;  %s274_s0 = inlined_call_operand.vmem [shape: f32[8,128], index: 0, kind: input, shape index: {}]   ;;  %s275_s2 = inlined_call_operand.vmem [shape: f32[1,128], index: 2, kind: input, shape index: {}]   ;;  %s276_s3 = inlined_call_operand.vmem [shape: f32[8,128], index: 3, kind: output, shape index: {}]  }
   0x1   :  { %166 = vmatprep.subr.bf16.mxu0 %v193_v0  ;;  %v15_v1 = vld [vmem:[%s273_s1] sm:$0xff]  ;;  %v16_v2 = vld [vmem:[%s273_s1 + $0x8] sm:$0xff]  ;;  %v17_v3 = vld [vmem:[%s273_s1 + $0x10] sm:$0xff]  ;;  %163 = vmatprep.mubr.msk.f32.mxu0 %vm194_vm0, %v195_v4 }
   0x2   :  { %v167_v5 = vpack.c.bf16 %v16_v2, %v15_v1  ;;  %v18_v6 = vld [vmem:[%s273_s1 + $0x18] sm:$0xff]  ;;  %v19_v8 = vld [vmem:[%s273_s1 + $0x20] sm:$0xff]  ;;  %v20_v9 = vld [vmem:[%s273_s1 + $0x28] sm:$0xff] }
   0x3   :  { %v170_v7 = vpack.c.bf16 %v18_v6, %v17_v3  ;;  %v173_v10 = vpack.c.bf16 %v20_v9, %v19_v8  ;;  %v21_v11 = vld [vmem:[%s273_s1 + $0x30] sm:$0xff]  ;;  %v22_v12 = vld [vmem:[%s273_s1 + $0x38] sm:$0xff]  ;;  %v23_v14 = vld [vmem:[%s273_s1 + $0x40] sm:$0xff] }
   0x4   :  { %168 = vmatpush3.bf16.msra.mxu0 %v167_v5  ;;  %v176_v13 = vpack.c.bf16 %v22_v12, %v21_v11  ;;  %v24_v15 = vld [vmem:[%s273_s1 + $0x48] sm:$0xff]  ;;  %v25_v17 = vld [vmem:[%s273_s1 + $0x50] sm:$0xff]  ;;  %v26_v18 = vld [vmem:[%s273_s1 + $0x58] sm:$0xff] }
   0x5   :  { %169 = vmatprep.subr.bf16.mxu0 %v193_v0  ;;  %v179_v16 = vpack.c.bf16 %v24_v15, %v23_v14  ;;  %v182_v19 = vpack.c.bf16 %v26_v18, %v25_v17  ;;  %v27_v20 = vld [vmem:[%s273_s1 + $0x60] sm:$0xff]  ;;  %v28_v21 = vld [vmem:[%s273_s1 + $0x68] sm:$0xff]  ;;  %v29_v23 = vld [vmem:[%s273_s1 + $0x70] sm:$0xff] }
   0x6   :  { %v185_v22 = vpack.c.bf16 %v28_v21, %v27_v20  ;;  %v30_v24 = vld [vmem:[%s273_s1 + $0x78] sm:$0xff]  ;;  %v14_v26 = vld [vmem:[%s274_s0] sm:$0xff] }
   0x7   :  { %v188_v25 = vpack.c.bf16 %v30_v24, %v29_v23  ;;  %v113_v27 = vld [vmem:[%s275_s2] ss:$0 sm:$0xff] }
   0x8   :  { %171 = vmatpush3.bf16.msra.mxu0 %v170_v7 }
   0x9   :  { %172 = vmatprep.subr.bf16.mxu0 %v193_v0 }
   0xc   :  { %174 = vmatpush3.bf16.msra.mxu0 %v173_v10 }
   0xd   :  { %175 = vmatprep.subr.bf16.mxu0 %v193_v0 }
  0x10   :  { %177 = vmatpush3.bf16.msra.mxu0 %v176_v13 }
  0x11   :  { %178 = vmatprep.subr.bf16.mxu0 %v193_v0 }
  0x14   :  { %180 = vmatpush3.bf16.msra.mxu0 %v179_v16 }
  0x15   :  { %181 = vmatprep.subr.bf16.mxu0 %v193_v0 }
  0x18   :  { %183 = vmatpush3.bf16.msra.mxu0 %v182_v19 }
  0x19   :  { %184 = vmatprep.subr.bf16.mxu0 %v193_v0 }
  0x1c   :  { %186 = vmatpush3.bf16.msra.mxu0 %v185_v22 }
  0x1d   :  { %187 = vmatprep.subr.bf16.mxu0 %v193_v0 }
  0x20   :  { %189 = vmatpush3.bf16.msra.mxu0 %v188_v25 }
  0x23   :  { %164 = vmatmul.mubr.f32.vlgmr.msra.gmra.mrb[0].mxu0 %v14_v26 }
  0xf6   :  { %v104_v28 = vpop.f32.mrb[0].mxu0 }
  0xf7   :  { %v105_v29 = vadd.f32 %v113_v27, %v104_v28  ;;  %v165_v30 = vpop.f32.mrb[1].mxu0 }
  0xf9   :  { %108 = vst [vmem:[%s276_s3] sm:$0xff] %v105_v29 }

// kernel: mechanistic_autoencoder_forward.17
= control target key start
LH: loop header
LB: loop body
LE: loop exit
PB: predicated region body
PF: predicated region fallthrough
CT: control target
= control target key end

     0   :  { %16 = vsyncpa [#allocation3], 0  ;;  %s838_s0 = inlined_call_operand.vmem [shape: f32[8,2,1], index: 0, kind: input, shape index: {}]   ;;  %s839_s1 = inlined_call_operand.vmem [shape: f32[2,10], index: 1, kind: input, shape index: {}]   ;;  %s840_s2 = inlined_call_operand.vmem [shape: f32[1,10], index: 2, kind: input, shape index: {}]   ;;  %s841_s3 = inlined_call_operand.vmem [shape: f32[1,10], index: 3, kind: input, shape index: {}]   ;;  %s842_s4 = inlined_call_operand.vmem [shape: f32[8,2,1], index: 4, kind: output, shape index: {0}]   ;;  %s843_s5 = inlined_call_operand.vmem [shape: f32[8,2,1], index: 5, kind: output, shape index: {1}]   ;;  %s844_s6 = inlined_call_operand.vmem [shape: f32[8,2,1], index: 6, kind: output, shape index: {2}]   ;;  %s845_s7 = inlined_call_operand.vmem [shape: f32[8,2,1], index: 7, kind: output, shape index: {3}]   ;;  %s846_s8 = inlined_call_operand.hbm [shape: f32[2,6], index: 8, kind: output, shape index: {4}]   ;;  %s847_s9 = inlined_call_operand.hbm [shape: f32[2,4], index: 9, kind: output, shape index: {5}]   ;;  %s848_s10 = inlined_call_operand.vmem [shape: f32[8,2,1], index: 10, kind: output, shape index: {6}]  }
   0x1   :  { %v29_v0 = vld [vmem:[%s839_s1] sm:$0x3]  ;;  %v59_v3 = vld [vmem:[%s838_s0 + $0x2] sm:$0x3]  ;;  %v60_v4 = vld [vmem:[%s838_s0 + $0x4] sm:$0x3] }
   0x2   :  { %v355_v1 = vmul.f32 -1.442695, %v29_v0  ;;  %v58_v2 = vld [vmem:[%s838_s0] sm:$0x3]  ;;  %v61_v5 = vld [vmem:[%s838_s0 + $0x6] sm:$0x3] }
   0x3   :  { %v62_v6 = vld [vmem:[%s838_s0 + $0x8] sm:$0x3]  ;;  %v63_v7 = vld [vmem:[%s838_s0 + $0xa] sm:$0x3]  ;;  %v356_v8 = vmul.f32 -1.442695, %v58_v2 }
   0x4   :  { %433 = vpow2.f32 %v355_v1  ;;  %v357_v9 = vmul.f32 -1.442695, %v59_v3 }
   0x5   :  { %17 = vsyncpa [#allocation5], 0  ;;  %v64_v10 = vld [vmem:[%s838_s0 + $0xc] sm:$0x3]  ;;  %v358_v11 = vmul.f32 -1.442695, %v60_v4  ;;  %435 = vpow2.f32 %v356_v8  ;;  %v37_v17 = vlaneseq }
   0x6   :  { %v359_v12 = vmul.f32 -1.442695, %v61_v5  ;;  %v65_v13 = vld [vmem:[%s838_s0 + $0xe] sm:$0x3]  ;;  %v360_v14 = vmul.f32 -1.442695, %v62_v6  ;;  %437 = vpow2.f32 %v357_v9 }
   0x7   :  { %v361_v15 = vmul.f32 -1.442695, %v63_v7  ;;  %439 = vpow2.f32 %v358_v11  ;;  %v362_v16 = vmul.f32 -1.442695, %v64_v10  ;;  %v363_v18 = vmul.f32 -1.442695, %v65_v13 }
   0x8   :  { %441 = vpow2.f32 %v359_v12  ;;  %v38_v21 = vshrl.u32 %v37_v17, 7  ;;  %v26_v22 = vld [vmem:[%s840_s2] sm:$0x1]  ;;  %vm50_vm0 = vcmask 41984   ;;  %s559_s2 = smov 122   ;;  %vm122_vm1 = vcmask 1024  }
   0x9   :  { %443 = vpow2.f32 %v360_v14  ;;  %v27_v23 = vld [vmem:[%s841_s3] sm:$0x1]  ;;  %s560_s3 = smov 121   ;;  %s561_s15 = smov 1   ;;  %vm56_vm2 = vcmask 25600  }
   0xa   :  { %445 = vpow2.f32 %v361_v15  ;;  %v28_v26 = vsub.f32 %v27_v23, %v26_v22  ;;  %v39_v27 = vsub.s32 0, %v38_v21  ;;  %s562_s16 = smov 120   ;;  %s563_s24 = smov 119  }
   0xb   :  { %447 = vpow2.f32 %v362_v16 }
   0xc   :  { %449 = vpow2.f32 %v363_v18  ;;  %v40_v36 = vrot.slane %v28_v26, %v39_v27  ;;  %v47_v41 = vrot.slane %v26_v22, %v39_v27 }
   0xe   :  { %v434_v19 = vpop.eup %433 }
   0xf   :  { %v33_v20 = vadd.f32 1.0, %v434_v19  ;;  %v436_v24 = vpop.eup %435 }
  0x10   :  { %v438_v25 = vpop.eup %437  ;;  %v90_v28 = vadd.f32 1.0, %v436_v24 }
  0x11   :  { %451 = vrcp.f32 %v33_v20  ;;  %v440_v29 = vpop.eup %439  ;;  %v91_v30 = vadd.f32 1.0, %v438_v25 }
  0x12   :  { %v442_v31 = vpop.eup %441  ;;  %v92_v32 = vadd.f32 1.0, %v440_v29  ;;  %453 = vrcp.f32 %v90_v28 }
  0x13   :  { %v444_v33 = vpop.eup %443  ;;  %v93_v34 = vadd.f32 1.0, %v442_v31  ;;  %455 = vrcp.f32 %v91_v30 }
  0x14   :  { %v446_v35 = vpop.eup %445  ;;  %v94_v37 = vadd.f32 1.0, %v444_v33  ;;  %457 = vrcp.f32 %v92_v32 }
  0x15   :  { %v448_v38 = vpop.eup %447  ;;  %v95_v39 = vadd.f32 1.0, %v446_v35  ;;  %459 = vrcp.f32 %v93_v34 }
  0x16   :  { %v450_v40 = vpop.eup %449  ;;  %v96_v42 = vadd.f32 1.0, %v448_v38  ;;  %461 = vrcp.f32 %v94_v37 }
  0x17   :  { %v97_v44 = vadd.f32 1.0, %v450_v40  ;;  %463 = vrcp.f32 %v95_v39 }
  0x18   :  { %465 = vrcp.f32 %v96_v42 }
  0x19   :  { %467 = vrcp.f32 %v97_v44 }
  0x1b   :  { %v452_v43 = vpop.eup %451 }
  0x1c   :  { %v42_v45 = vmul.f32 %v452_v43, %v40_v36  ;;  %v454_v47 = vpop.eup %453 }
  0x1d   :  { %v456_v48 = vpop.eup %455  ;;  %v114_v49 = vmul.f32 1000.0, %v454_v47 }
  0x1e   :  { %v667_v46 = vadd.f32 %v47_v41, %v42_v45   ;;  %v458_v50 = vpop.eup %457  ;;  %v115_v51 = vmul.f32 1000.0, %v456_v48 }
  0x1f   :  { %v460_v52 = vpop.eup %459  ;;  %v116_v53 = vmul.f32 1000.0, %v458_v50  ;;  %123 = vst.msk [vmem:[%s848_s10] sm:$0x3] %vm122_vm1, %v114_v49 }
  0x20   :  { %53 = vrot.lane.b32.xlu0 %v667_v46, %s559_s2  ;;  %51 = vst.msk [vmem:[#allocation2] sm:$0x3] %vm50_vm0, %v667_v46  ;;  %469 = vrcp.f32 %v667_v46  ;;  %138 = vrot.lane.b32.xlu1 %v667_v46, %s560_s3  ;;  %v462_v54 = vpop.eup %461  ;;  %v117_v55 = vmul.f32 1000.0, %v460_v52  ;;  %v849_v6 = vmov %v667_v46  ;;  %v850_v7 = vmov %v667_v46 }
  0x21   :  { %124 = vst.msk [vmem:[%s848_s10 + $0x2] sm:$0x3] %vm122_vm1, %v115_v51  ;;  %v464_v56 = vpop.eup %463  ;;  %v118_v57 = vmul.f32 1000.0, %v462_v54  ;;  %125 = vst.msk [vmem:[%s848_s10 + $0x4] sm:$0x3] %vm122_vm1, %v116_v53  ;;  %v851_v8 = vmov %v667_v46  ;;  %v852_v9 = vmov %v667_v46 }
  0x22   :  { %v466_v58 = vpop.eup %465  ;;  %v119_v59 = vmul.f32 1000.0, %v464_v56  ;;  %126 = vst.msk [vmem:[%s848_s10 + $0x6] sm:$0x3] %vm122_vm1, %v117_v55 }
  0x23   :  { %v468_v60 = vpop.eup %467  ;;  %v120_v61 = vmul.f32 1000.0, %v466_v58  ;;  %127 = vst.msk [vmem:[%s848_s10 + $0x8] sm:$0x3] %vm122_vm1, %v118_v57 }
  0x24   :  { %133 = vrot.lane.b32.xlu0 %v667_v46, %s561_s15  ;;  %142 = vrot.lane.b32.xlu1 %v667_v46, %s562_s16  ;;  %v121_v62 = vmul.f32 1000.0, %v468_v60  ;;  %128 = vst.msk [vmem:[%s848_s10 + $0xa] sm:$0x3] %vm122_vm1, %v119_v59  ;;  %s741_s16 = smov 0  }
  0x25   :  { %129 = vst.msk [vmem:[%s848_s10 + $0xc] sm:$0x3] %vm122_vm1, %v120_v61 }
  0x26   :  { %130 = vst.msk [vmem:[%s848_s10 + $0xe] sm:$0x3] %vm122_vm1, %v121_v62 }
  0x28   :  { %146 = vrot.lane.b32.xlu0 %v667_v46, %s563_s24 }
  0x2a   :  { %v704_v63 = vpop.eup %469 }
  0x92   :  { %v54_v0 = vpop.permute.xlu0 %53  ;;  %v139_v1 = vpop.permute.xlu1 %138 }
  0x93   :  { %57 = vst.msk [vmem:[#allocation4] sm:$0x3] %vm56_vm2, %v54_v0 }
  0x94   :  { %137 = vst.msk [vmem:[%s842_s4] sm:$0x3] %vm122_vm1, %v54_v0  ;;  %141 = vst.msk [vmem:[%s843_s5] sm:$0x3] %vm122_vm1, %v139_v1 }
  0x96   :  { %v134_v2 = vpop.permute.xlu0 %133  ;;  %v143_v3 = vpop.permute.xlu1 %142 }
  0x97   :  { %v719_v4 = vmul.f32 %v134_v2, %v667_v46  ;;  %145 = vst.msk [vmem:[%s844_s6] sm:$0x3] %vm122_vm1, %v143_v3 }
  0x9a   :  { %v147_v5 = vpop.permute.xlu0 %146 }
  0x9b   :  { %149 = vst.msk [vmem:[%s845_s7] sm:$0x3] %vm122_vm1, %v147_v5 }
  0x9c LB: > { %s564_s17 = smov 5   ;;  %v160_v10 = vmax.f32 %v553_v9, 0.0  ;;  %s565_s18 = smov 124   ;;  %v161_v14 = vmax.f32 %v549_v8, 0.0  ;;  %v163_v20 = vmax.f32 %v541_v6, 0.0  ;;  %v162_v23 = vmax.f32 %v545_v7, 0.0  ;;  %s557_s16 = sphi %s741_s16, %s155_s16   ;;  %v553_v9 = vphi %v852_v9, %v239_v9   ;;  %v549_v8 = vphi %v851_v8, %v245_v8   ;;  %v545_v7 = vphi %v850_v7, %v247_v7   ;;  %v541_v6 = vphi %v849_v6, %v249_v6  }
  0x9d   : > { %196 = vrot.lane.b32.xlu0 %v667_v46, %s564_s17  ;;  %s566_s19 = smov 127   ;;  %s567_s20 = smov 1   ;;  %v216_v31 = vsub.f32 0.0, %v667_v46 }
  0x9e   : > { %s568_s21 = smov 9   ;;  %s569_s22 = smov 8   ;;  %v190_v28 = vsub.f32 0.0, %v161_v14  ;;  %v179_v42 = vsub.f32 0.0, %v163_v20  ;;  %v168_v43 = vsub.f32 0.0, %v162_v23 }
  0x9f   : > { %s570_s23 = smov 125   ;;  %s765_s1 = sshll.u32 %s557_s16, 1 }
  0xa0   : > { %s165_s26 = scalar_lea.vmem %s848_s10, %s765_s1  ;;  %s571_s27 = smov 126  }
  0xa1   : > { %v166_v18 = vld [vmem:[%s165_s26] sm:$0x3]  ;;  %s572_s28 = smov 3   ;;  %s573_s29 = smov 122  }
  0xa2   : > { %v167_v24 = vmul.f32 0.008571428, %v166_v18  ;;  %s574_s30 = smov 121   ;;  %s575_s11 = smov 120  }
  0xa3   : > { %s576_s0 = smov 119   ;;  %s327_s3 = scalar_lea.vmem %s842_s4, %s765_s1 }
  0xa4   : > { %s330_s15 = scalar_lea.vmem %s843_s5, %s765_s1  ;;  %s155_s16 = sadd.s32 1, %s557_s16  }
  0xa5   : > { %p152_p0 = scmp.ge.s32.totalorder %s155_s16, 7  }
  0xa6   :  { %s578_s24 = smov (%p152_p0), [#allocation4]  }
  0xa7   :  { %s300_s25 = sshll.u32 (%p152_p0), %s578_s24, 4  ;;  %s301_s25 = int_to_ptr.vmem [resolvable:$true] %s300_s25 }
 0x10f   : > { %v197_v11 = vpop.permute.xlu0 %196 }
 0x110   : > { %v199_v12 = vsub.f32 %v160_v10, %v197_v11 }
 0x112   : > { %201 = vrot.lane.b32.xlu0 %v199_v12, %s565_s18  ;;  %v222_v13 = vmax.f32 %v199_v12, 0.0 }
 0x114   : > { %224 = vrot.lane.b32.xlu1 %v222_v13, %s566_s19 }
 0x116   : > { %192 = vrot.lane.b32.xlu0 %v160_v10, %s567_s20 }
 0x118   : > { %180 = vrot.lane.b32.xlu1 %v704_v63, %s568_s21 }
 0x11c   : > { %170 = vrot.lane.b32.xlu1 %v704_v63, %s569_s22 }
 0x120   : > { %218 = vrot.lane.b32.xlu1 %v161_v14, %s570_s23  ;;  %s577_s23 = smov (%p152_p0), [#allocation2]  }
 0x184   : > { %v202_v15 = vpop.permute.xlu0 %201 }
 0x185   : > { %v204_v16 = vmul.f32 %v202_v15, %v667_v46 }
 0x186   : > { %v225_v17 = vpop.permute.xlu1 %224 }
 0x187   : > { %206 = vrot.lane.b32.xlu0 %v204_v16, %s564_s17  ;;  %v227_v19 = vmul.f32 %v225_v17, %v667_v46 }
 0x188   : > { %v193_v27 = vpop.permute.xlu0 %192 }
 0x189   : > { %v195_v32 = vmul.f32 %v193_v27, %v190_v28 }
 0x18a   : > { %v181_v21 = vpop.permute.xlu1 %180 }
 0x18b   : > { %v210_v22 = vmul.f32 %v181_v21, %v163_v20  ;;  %229 = vrot.lane.b32.xlu0 %v227_v19, %s566_s19  ;;  %v183_v47 = vmul.f32 %v181_v21, %v179_v42 }
 0x18d   : > { %212 = vrot.lane.b32.xlu1 %v210_v22, %s571_s27 }
 0x18e   : > { %v171_v25 = vpop.permute.xlu1 %170 }
 0x18f   : > { %v184_v26 = vmul.f32 %v171_v25, %v162_v23  ;;  %175 = vrot.lane.b32.xlu0 %v167_v24, %s569_s22  ;;  %v173_v48 = vmul.f32 %v171_v25, %v168_v43  ;;  %s336_s22 = scalar_lea.vmem %s845_s7, %s765_s1 }
 0x191   : > { %186 = vrot.lane.b32.xlu1 %v184_v26, %s567_s20 }
 0x192   : > { %v219_v30 = vpop.permute.xlu1 %218 }
 0x193   : > { %v221_v35 = vmul.f32 %v219_v30, %v216_v31 }
 0x1f9   : > { %v207_v29 = vpop.permute.xlu0 %206 }
 0x1fa   : > { %v209_v34 = vsub.f32 %v195_v32, %v207_v29 }
 0x1fd   : > { %v230_v33 = vpop.permute.xlu0 %229 }
 0x1fe   : > { %v232_v36 = vmul.f32 %v230_v33, %v719_v4 }
 0x1ff   : > { %v213_v37 = vpop.permute.xlu1 %212 }
 0x200   : > { %v233_v38 = vadd.f32 %v232_v36, %v221_v35  ;;  %v215_v39 = vadd.f32 %v213_v37, %v209_v34 }
 0x201   : > { %v176_v44 = vpop.permute.xlu0 %175 }
 0x202   : > { %v240_v40 = vmul.f32 5.0, %v233_v38  ;;  %v234_v41 = vmul.f32 5.0, %v215_v39  ;;  %v178_v49 = vadd.f32 %v176_v44, %v173_v48 }
 0x203   : > { %v187_v45 = vpop.permute.xlu1 %186 }
 0x204   : > { %242 = vrot.lane.b32.xlu1 %v240_v40, %s572_s28  ;;  %236 = vrot.lane.b32.xlu0 %v234_v41, %s566_s19  ;;  %v189_v50 = vadd.f32 %v187_v45, %v183_v47  ;;  %v246_v53 = vmul.f32 5.0, %v178_v49  ;;  %s333_s19 = scalar_lea.vmem %s844_s6, %s765_s1  ;;  %s290_s1 = sshll.u32 (%p152_p0), %s577_s23, 4  ;;  %s291_s1 = int_to_ptr.vmem [resolvable:$true] %s290_s1 }
 0x205   :  { %s471_s26 = scalar_lea.vmem (%p152_p0), %s291_s1, 32  ;;  %p476_p2 = scmp.lt.s32.totalorder (%p152_p0), %s291_s1, %s291_s1 }
 0x206   : > { %v248_v54 = vmul.f32 5.0, %v189_v50  ;;  %v247_v7 = vadd.f32 %v545_v7, %v246_v53   ;;  %p472_p1 = scmp.ne.s32.totalorder (%p152_p0), %s291_s1, %s471_s26  ;;  %p477_p3 = scmp.lt.s32.totalorder (%p152_p0), %s471_s26, %s471_s26 }
 0x208   : > { %v249_v6 = vadd.f32 %v541_v6, %v248_v54   ;;  %p478_p4 = por (%p152_p0), %p477_p3, %p476_p2 }
 0x20a   :  { %p479_p5 = pnand (%p152_p0), %p478_p4, %p472_p1 }
 0x276   : > { %v237_v51 = vpop.permute.xlu0 %236  ;;  %v243_v52 = vpop.permute.xlu1 %242 }
 0x277   : > { %v239_v9 = vadd.f32 %v553_v9, %v237_v51   ;;  %v245_v8 = vadd.f32 %v549_v8, %v243_v52  }
 0x279   : > { %252 = vrot.lane.b32.xlu0 %v239_v9, %s573_s29  ;;  %259 = vrot.lane.b32.xlu1 %v245_v8, %s574_s30 }
 0x27d   : > { %265 = vrot.lane.b32.xlu0 %v247_v7, %s575_s11  ;;  %271 = vrot.lane.b32.xlu1 %v249_v6, %s576_s0 }
 0x2ea   :  { %154 = sbr.rel (!%p152_p0) target bundleno = 156 (0x9c), region = 96 }
 0x2eb   : > { %v253_v55 = vpop.permute.xlu0 %252  ;;  %v260_v56 = vpop.permute.xlu1 %259 }
 0x2ec   : > { %366 = vst.msk [vmem:[%s327_s3 + $0x2] sm:$0x3] %vm122_vm1, %v253_v55  ;;  %368 = vst.msk [vmem:[%s330_s15 + $0x2] sm:$0x3] %vm122_vm1, %v260_v56 }
 0x2ef   : > { %v266_v57 = vpop.permute.xlu0 %265  ;;  %v272_v58 = vpop.permute.xlu1 %271 }
 0x2f0   : > { %370 = vst.msk [vmem:[%s333_s19 + $0x2] sm:$0x3] %vm122_vm1, %v266_v57  ;;  %372 = vst.msk [vmem:[%s336_s22 + $0x2] sm:$0x3] %vm122_vm1, %v272_v58 }
 0x2f1   :  { %482 = shalt.err (!%p479_p5)
}
 0x2f2   :  { %s483_s29 = scalar_lea.hbm %s846_s8, 32 }
 0x2f3   :  { %p484_p6 = scmp.ne.s32.totalorder %s846_s8, %s483_s29  ;;  %p487_p7 = scmp.lt.u32.totalorder %s483_s29, %s846_s8 }
 0x2f5   :  { %p489_p8 = pnand %p487_p7, %p484_p6 }
 0x2f7   :  { %492 = shalt.err (!%p489_p8)
}
 0x2f8   :  { %293 = dma.vmem_to_hbm [thread:$0]  %s291_s1, 32, %s846_s8, [#allocation3]  }
 0x2f9   :  { %s493_s10 = scalar_lea.vmem %s301_s25, 32  ;;  %p498_p10 = scmp.lt.s32.totalorder %s301_s25, %s301_s25 }
 0x2fa   :  { %p494_p9 = scmp.ne.s32.totalorder %s301_s25, %s493_s10  ;;  %p499_p11 = scmp.lt.s32.totalorder %s493_s10, %s493_s10 }
 0x2fc   :  { %p500_p12 = por %p499_p11, %p498_p10 }
 0x2fe   :  { %p501_p13 = pnand %p500_p12, %p494_p9 }
 0x300   :  { %504 = shalt.err (!%p501_p13)
}
 0x301   :  { %s505_s12 = scalar_lea.hbm %s847_s9, 32 }
 0x302   :  { %p506_p0 = scmp.ne.s32.totalorder %s847_s9, %s505_s12  ;;  %p509_p1 = scmp.lt.u32.totalorder %s505_s12, %s847_s9 }
 0x304   :  { %p511_p2 = pnand %p509_p1, %p506_p0 }
 0x306   :  { %514 = shalt.err (!%p511_p2)
}
 0x307   :  { %303 = dma.vmem_to_hbm [thread:$0]  %s301_s25, 32, %s847_s9, [#allocation5]  }
 0x308   :  { %535 = dma.done.wait [#allocation3], 32  }
 0x309   :  { %536 = vsyncadd [#allocation3], 4294967264 }
 0x30a   :  { %537 = dma.done.wait [#allocation5], 32  }
 0x30b   :  { %538 = vsyncadd [#allocation5], 4294967264 }
 0x30c   :  { %322 = vsyncpa [#allocation3], 1 }
 0x30d   :  { %323 = vsyncpa [#allocation5], 1 }

</bundles_post_ra>
